<compile_context>
chip_gen: v7x
topology: tpu7x:2x2x1
jax: 0.10.0
libtpu: 0.0.40
codegen_flags: <defaults>
</compile_context>

<pallas_src>
import jax
import jax.numpy as jnp
import numpy as np
from jax.experimental import pallas as pl
from jax.experimental.pallas import tpu as pltpu

_HIDDEN = 512
_LANE = 128          # lane-dense width for the padded final layer / output


def _round_up(x, m):
    return (x + m - 1) // m * m


def _discriminator_kernel(x_ref, e_ref,
                          w1x_ref, w1e_ref, b1_ref,
                          w2_ref, b2_ref,
                          w3_ref, b3_ref,
                          w4_ref, b4_ref,
                          o_ref):
    """One batch tile of the Discriminator MLP (weight-stationary, bf16 MXU)."""
    slope = jnp.float32(0.2)

    def lrelu_bf16(v):
        # LeakyReLU(0.2) in f32, then one bf16 cast for the next MXU dot.
        return jnp.where(v > 0, v, slope * v).astype(jnp.bfloat16)

    # In-kernel bf16 cast of the f32 image tile (no separate XLA cast pass).
    x = x_ref[...].astype(jnp.bfloat16)                          # (TM, d_img)

    # Layer 1: big aligned-K dot (image part) + tiny sublane-padded dot (label
    # embedding part) instead of one misaligned K = d_img + n_classes dot.
    h = jnp.dot(x, w1x_ref[...], preferred_element_type=jnp.float32)
    h = h + jnp.dot(e_ref[...], w1e_ref[...],
                    preferred_element_type=jnp.float32)
    h = lrelu_bf16(h + b1_ref[...])                              # (TM, 512) bf16

    # Layer 2 (+ Dropout(0.4) -> identity in eval mode).
    h = lrelu_bf16(jnp.dot(h, w2_ref[...],
                           preferred_element_type=jnp.float32) + b2_ref[...])

    # Layer 3 (+ Dropout(0.4) -> identity in eval mode).
    h = lrelu_bf16(jnp.dot(h, w3_ref[...],
                           preferred_element_type=jnp.float32) + b3_ref[...])

    # Layer 4: lane-padded to 128 output columns (column 0 = real logit) so the
    # output store is a full unmasked vreg.
    o_ref[...] = (jnp.dot(h, w4_ref[...],
                          preferred_element_type=jnp.float32) + b4_ref[...])


def prepare_params(params):
    """Convert f32 'PyTorch-layout' params into kernel-ready params:
    bf16 weights + bf16 sublane-padded embedding table, split layer-1 weight,
    lane-padded layer-4."""
    emb = params["emb"]
    n_classes = emb.shape[1]
    w1 = params["w1"]
    d_img = w1.shape[0] - n_classes
    nc_p = _round_up(n_classes, 8)                 # sublane-pad tiny K
    hidden = w1.shape[1]

    w1x = w1[:d_img]                               # (d_img, 512)
    w1e = jnp.zeros((nc_p, hidden), w1.dtype).at[:n_classes].set(w1[d_img:])
    emb_p = jnp.zeros((emb.shape[0], nc_p), jnp.bfloat16)
    emb_p = emb_p.at[:, :n_classes].set(emb.astype(jnp.bfloat16))

    w4, b4 = params["w4"], params["b4"]            # (512, 1), (1, 1)
    w4p = jnp.zeros((w4.shape[0], _LANE), jnp.float32).at[:, :1].set(w4)
    b4p = jnp.zeros((1, _LANE), jnp.float32).at[:, :1].set(b4)

    return {
        "emb": emb_p,                              # (n_classes, nc_p) bf16
        "w1x": w1x.astype(jnp.bfloat16),
        "w1e": w1e.astype(jnp.bfloat16),
        "b1": params["b1"],
        "w2": params["w2"].astype(jnp.bfloat16),
        "b2": params["b2"],
        "w3": params["w3"].astype(jnp.bfloat16),
        "b3": params["b3"],
        "w4": w4p.astype(jnp.bfloat16),
        "b4": b4p,
    }


def _choose_tm(B, d_img):
    """Batch tile: big enough to amortize per-step overhead, >= 2 tiles when B
    is large (both v7x TensorCores), rounded to 16 rows (bf16 packing), and
    capped so one (TM, d_img) f32 input buffer stays around ~4 MiB."""
    vmem_cap = max(16, (((4 << 20) // (4 * d_img)) // 16) * 16)
    if B >= 1024:
        tm = 512
    elif B >= 64:
        tm = min(256, _round_up(-(-B // 2), 16))   # at least 2 batch tiles
    else:
        tm = _round_up(B, 16)
    return max(16, min(tm, vmem_cap))


def discriminator_forward(img, labels, kparams):
    """img: (B, C, H, W) float32, labels: (B,) int32, kparams: prepare_params()."""
    B = img.shape[0]
    x_img = img.reshape(B, -1)                                # (B, d_img) f32 view
    emb = kparams["emb"][labels]                              # (B, nc_p) bf16 gather (glue)
    d_img = x_img.shape[1]
    nc_p = emb.shape[1]
    H = kparams["w2"].shape[0]

    TM = _choose_tm(B, d_img)
    Bp = _round_up(B, TM)
    if Bp != B:
        x_img = jnp.pad(x_img, ((0, Bp - B), (0, 0)))
        emb = jnp.pad(emb, ((0, Bp - B), (0, 0)))
    grid = (Bp // TM,)

    batch_spec = lambda shape: pl.BlockSpec(shape, lambda i: (i, 0))
    const_spec = lambda shape: pl.BlockSpec(shape, lambda i: (0, 0))

    flops = 2 * Bp * (d_img * H + nc_p * H + 2 * H * H + H * _LANE)
    bytes_accessed = (
        2 * (d_img * H + nc_p * H + 2 * H * H + H * _LANE)   # bf16 weights
        + 4 * (3 * H + _LANE)                                # f32 biases
        + 4 * Bp * d_img + 2 * Bp * nc_p                     # f32 img + bf16 emb in
        + 4 * Bp * _LANE)                                    # f32 (padded) output
    cost = pl.CostEstimate(flops=flops, transcendentals=0,
                           bytes_accessed=bytes_accessed)

    out = pl.pallas_call(
        _discriminator_kernel,
        out_shape=jax.ShapeDtypeStruct((Bp, _LANE), jnp.float32),
        grid=grid,
        in_specs=[
            batch_spec((TM, d_img)),                       # img features (f32)
            batch_spec((TM, nc_p)),                        # label embedding (bf16)
            const_spec((d_img, H)), const_spec((nc_p, H)), const_spec((1, H)),
            const_spec((H, H)), const_spec((1, H)),        # layer 2
            const_spec((H, H)), const_spec((1, H)),        # layer 3
            const_spec((H, _LANE)), const_spec((1, _LANE)),  # layer 4 (padded)
        ],
        out_specs=batch_spec((TM, _LANE)),
        compiler_params=pltpu.CompilerParams(
            dimension_semantics=("parallel",)),
        cost_estimate=cost,
    )(x_img, emb,
      kparams["w1x"], kparams["w1e"], kparams["b1"],
      kparams["w2"], kparams["b2"],
      kparams["w3"], kparams["b3"],
      kparams["w4"], kparams["b4"])

    return out[:B, :1]                                      # (B, 1)


def init_params(key, n_classes, img_shape):
    """Deterministic f32 init mimicking PyTorch defaults (uniform +-1/sqrt(fan_in))."""
    d_in = n_classes + int(np.prod(img_shape))
    hidden = _HIDDEN
    keys = jax.random.split(key, 9)

    def lin(kw, kb, fan_in, fan_out):
        bound = 1.0 / np.sqrt(fan_in)
        w = jax.random.uniform(kw, (fan_in, fan_out), jnp.float32, -bound, bound)
        b = jax.random.uniform(kb, (1, fan_out), jnp.float32, -bound, bound)
        return w, b

    emb = jax.random.normal(keys[0], (n_classes, n_classes), jnp.float32)
    w1, b1 = lin(keys[1], keys[2], d_in, hidden)
    w2, b2 = lin(keys[3], keys[4], hidden, hidden)
    w3, b3 = lin(keys[5], keys[6], hidden, hidden)
    w4, b4 = lin(keys[7], keys[8], hidden, 1)
    return dict(emb=emb, w1=w1, b1=b1, w2=w2, b2=b2, w3=w3, b3=b3, w4=w4, b4=b4)


def _reference_forward(img, labels, params):
    """Pure-JAX f32 reference matching the PyTorch module exactly (eval mode)."""
    B = img.shape[0]
    emb = params["emb"][labels]
    x = jnp.concatenate([img.reshape(B, -1), emb], axis=-1)

    def lrelu(v):
        return jnp.where(v > 0, v, 0.2 * v)

    h = lrelu(x @ params["w1"] + params["b1"])
    h = lrelu(h @ params["w2"] + params["b2"])
    h = lrelu(h @ params["w3"] + params["b3"])
    return h @ params["w4"] + params["b4"]


if __name__ == "__main__":
    n_classes = 4
    img_shape = (1, 16, 16)     # (C, H, W)
    batch = 8

    key = jax.random.PRNGKey(0)
    k_img, k_lbl, k_par = jax.random.split(key, 3)

    img = jax.random.normal(k_img, (batch,) + img_shape, jnp.float32)
    labels = jax.random.randint(k_lbl, (batch,), 0, n_classes, jnp.int32)
    params = init_params(k_par, n_classes, img_shape)
    kparams = prepare_params(params)

    out = discriminator_forward(img, labels, kparams)
    out = jax.block_until_ready(out)

    ref = _reference_forward(img, labels, params)
    assert out.shape == (batch, 1)
    # bf16 weights/embedding/activations vs f32 reference -> loose tolerance.
    np.testing.assert_allclose(np.asarray(out), np.asarray(ref),
                               rtol=3e-2, atol=3e-2)

    print("KERNEL_OK")
</pallas_src>

<mosaic_0001>
module attributes {stable_mosaic.version = 11 : i64} {
  func.func @_discriminator_kernel(%arg0: i32, %arg1: memref<16x256xf32, #tpu.memory_space<vmem>>, %arg2: memref<16x8xbf16, #tpu.memory_space<vmem>>, %arg3: memref<256x512xbf16, #tpu.memory_space<vmem>>, %arg4: memref<8x512xbf16, #tpu.memory_space<vmem>>, %arg5: memref<1x512xf32, #tpu.memory_space<vmem>>, %arg6: memref<512x512xbf16, #tpu.memory_space<vmem>>, %arg7: memref<1x512xf32, #tpu.memory_space<vmem>>, %arg8: memref<512x512xbf16, #tpu.memory_space<vmem>>, %arg9: memref<1x512xf32, #tpu.memory_space<vmem>>, %arg10: memref<512x128xbf16, #tpu.memory_space<vmem>>, %arg11: memref<1x128xf32, #tpu.memory_space<vmem>>, %arg12: memref<16x128xf32, #tpu.memory_space<vmem>>) attributes {dimension_semantics = [#tpu.dimension_semantics<parallel>], iteration_bounds = array<i64: 1>, scalar_prefetch = 0 : i64, scratch_operands = 0 : i64, tpu.core_type = #tpu.core_type<tc>, window_params = [{transform_indices = @transform_0, window_bounds = array<i64: 16, 256>}, {transform_indices = @transform_1, window_bounds = array<i64: 16, 8>}, {pipeline_mode = #tpu.pipeline_mode<synchronous>, transform_indices = @transform_2, window_bounds = array<i64: 256, 512>}, {pipeline_mode = #tpu.pipeline_mode<synchronous>, transform_indices = @transform_3, window_bounds = array<i64: 8, 512>}, {pipeline_mode = #tpu.pipeline_mode<synchronous>, transform_indices = @transform_4, window_bounds = array<i64: 1, 512>}, {pipeline_mode = #tpu.pipeline_mode<synchronous>, transform_indices = @transform_5, window_bounds = array<i64: 512, 512>}, {pipeline_mode = #tpu.pipeline_mode<synchronous>, transform_indices = @transform_6, window_bounds = array<i64: 1, 512>}, {pipeline_mode = #tpu.pipeline_mode<synchronous>, transform_indices = @transform_7, window_bounds = array<i64: 512, 512>}, {pipeline_mode = #tpu.pipeline_mode<synchronous>, transform_indices = @transform_8, window_bounds = array<i64: 1, 512>}, {pipeline_mode = #tpu.pipeline_mode<synchronous>, transform_indices = @transform_9, window_bounds = array<i64: 512, 128>}, {pipeline_mode = #tpu.pipeline_mode<synchronous>, transform_indices = @transform_10, window_bounds = array<i64: 1, 128>}, {transform_indices = @transform_11, window_bounds = array<i64: 16, 128>}]} {
    %c0 = arith.constant 0 : index
    %c0_0 = arith.constant 0 : index
    %0 = vector.load %arg1[%c0, %c0_0] : memref<16x256xf32, #tpu.memory_space<vmem>>, vector<16x256xf32>
    %1 = arith.truncf %0 : vector<16x256xf32> to vector<16x256xbf16>
    %c0_1 = arith.constant 0 : index
    %c0_2 = arith.constant 0 : index
    %2 = vector.load %arg3[%c0_1, %c0_2] : memref<256x512xbf16, #tpu.memory_space<vmem>>, vector<256x512xbf16>
    %cst = arith.constant dense<0.000000e+00> : vector<16x512xf32>
    %3 = tpu.matmul %1, %2, %cst {dimension_numbers = #tpu.dot_dimension_numbers<[1], [0], [0], [1], [0, 0, 1, 1], [], []>} : vector<16x256xbf16>, vector<256x512xbf16>, vector<16x512xf32> -> vector<16x512xf32>
    %c0_3 = arith.constant 0 : index
    %c0_4 = arith.constant 0 : index
    %4 = vector.load %arg2[%c0_3, %c0_4] : memref<16x8xbf16, #tpu.memory_space<vmem>>, vector<16x8xbf16>
    %c0_5 = arith.constant 0 : index
    %c0_6 = arith.constant 0 : index
    %5 = vector.load %arg4[%c0_5, %c0_6] : memref<8x512xbf16, #tpu.memory_space<vmem>>, vector<8x512xbf16>
    %cst_7 = arith.constant dense<0.000000e+00> : vector<16x512xf32>
    %6 = tpu.matmul %4, %5, %cst_7 {dimension_numbers = #tpu.dot_dimension_numbers<[1], [0], [0], [1], [0, 0, 1, 1], [], []>} : vector<16x8xbf16>, vector<8x512xbf16>, vector<16x512xf32> -> vector<16x512xf32>
    %7 = arith.addf %3, %6 : vector<16x512xf32>
    %c0_8 = arith.constant 0 : index
    %c0_9 = arith.constant 0 : index
    %8 = vector.load %arg5[%c0_8, %c0_9] : memref<1x512xf32, #tpu.memory_space<vmem>>, vector<1x512xf32>
    %9 = vector.broadcast %8 : vector<1x512xf32> to vector<16x512xf32>
    %10 = arith.addf %7, %9 : vector<16x512xf32>
    %cst_10 = arith.constant 0.000000e+00 : f32
    %11 = vector.broadcast %cst_10 : f32 to vector<16x512xf32>
    %12 = arith.cmpf ogt, %10, %11 : vector<16x512xf32>
    %cst_11 = arith.constant 2.000000e-01 : f32
    %13 = vector.broadcast %cst_11 : f32 to vector<16x512xf32>
    %14 = arith.mulf %13, %10 : vector<16x512xf32>
    %15 = arith.select %12, %10, %14 : vector<16x512xi1>, vector<16x512xf32>
    %16 = arith.truncf %15 : vector<16x512xf32> to vector<16x512xbf16>
    %c0_12 = arith.constant 0 : index
    %c0_13 = arith.constant 0 : index
    %17 = vector.load %arg6[%c0_12, %c0_13] : memref<512x512xbf16, #tpu.memory_space<vmem>>, vector<512x512xbf16>
    %cst_14 = arith.constant dense<0.000000e+00> : vector<16x512xf32>
    %18 = tpu.matmul %16, %17, %cst_14 {dimension_numbers = #tpu.dot_dimension_numbers<[1], [0], [0], [1], [0, 0, 1, 1], [], []>} : vector<16x512xbf16>, vector<512x512xbf16>, vector<16x512xf32> -> vector<16x512xf32>
    %c0_15 = arith.constant 0 : index
    %c0_16 = arith.constant 0 : index
    %19 = vector.load %arg7[%c0_15, %c0_16] : memref<1x512xf32, #tpu.memory_space<vmem>>, vector<1x512xf32>
    %20 = vector.broadcast %19 : vector<1x512xf32> to vector<16x512xf32>
    %21 = arith.addf %18, %20 : vector<16x512xf32>
    %cst_17 = arith.constant 0.000000e+00 : f32
    %22 = vector.broadcast %cst_17 : f32 to vector<16x512xf32>
    %23 = arith.cmpf ogt, %21, %22 : vector<16x512xf32>
    %cst_18 = arith.constant 2.000000e-01 : f32
    %24 = vector.broadcast %cst_18 : f32 to vector<16x512xf32>
    %25 = arith.mulf %24, %21 : vector<16x512xf32>
    %26 = arith.select %23, %21, %25 : vector<16x512xi1>, vector<16x512xf32>
    %27 = arith.truncf %26 : vector<16x512xf32> to vector<16x512xbf16>
    %c0_19 = arith.constant 0 : index
    %c0_20 = arith.constant 0 : index
    %28 = vector.load %arg8[%c0_19, %c0_20] : memref<512x512xbf16, #tpu.memory_space<vmem>>, vector<512x512xbf16>
    %cst_21 = arith.constant dense<0.000000e+00> : vector<16x512xf32>
    %29 = tpu.matmul %27, %28, %cst_21 {dimension_numbers = #tpu.dot_dimension_numbers<[1], [0], [0], [1], [0, 0, 1, 1], [], []>} : vector<16x512xbf16>, vector<512x512xbf16>, vector<16x512xf32> -> vector<16x512xf32>
    %c0_22 = arith.constant 0 : index
    %c0_23 = arith.constant 0 : index
    %30 = vector.load %arg9[%c0_22, %c0_23] : memref<1x512xf32, #tpu.memory_space<vmem>>, vector<1x512xf32>
    %31 = vector.broadcast %30 : vector<1x512xf32> to vector<16x512xf32>
    %32 = arith.addf %29, %31 : vector<16x512xf32>
    %cst_24 = arith.constant 0.000000e+00 : f32
    %33 = vector.broadcast %cst_24 : f32 to vector<16x512xf32>
    %34 = arith.cmpf ogt, %32, %33 : vector<16x512xf32>
    %cst_25 = arith.constant 2.000000e-01 : f32
    %35 = vector.broadcast %cst_25 : f32 to vector<16x512xf32>
    %36 = arith.mulf %35, %32 : vector<16x512xf32>
    %37 = arith.select %34, %32, %36 : vector<16x512xi1>, vector<16x512xf32>
    %38 = arith.truncf %37 : vector<16x512xf32> to vector<16x512xbf16>
    %c0_26 = arith.constant 0 : index
    %c0_27 = arith.constant 0 : index
    %39 = vector.load %arg10[%c0_26, %c0_27] : memref<512x128xbf16, #tpu.memory_space<vmem>>, vector<512x128xbf16>
    %cst_28 = arith.constant dense<0.000000e+00> : vector<16x128xf32>
    %40 = tpu.matmul %38, %39, %cst_28 {dimension_numbers = #tpu.dot_dimension_numbers<[1], [0], [0], [1], [0, 0, 1, 1], [], []>} : vector<16x512xbf16>, vector<512x128xbf16>, vector<16x128xf32> -> vector<16x128xf32>
    %c0_29 = arith.constant 0 : index
    %c0_30 = arith.constant 0 : index
    %41 = vector.load %arg11[%c0_29, %c0_30] : memref<1x128xf32, #tpu.memory_space<vmem>>, vector<1x128xf32>
    %42 = vector.broadcast %41 : vector<1x128xf32> to vector<16x128xf32>
    %43 = arith.addf %40, %42 : vector<16x128xf32>
    %c0_31 = arith.constant 0 : index
    %c0_32 = arith.constant 0 : index
    %44 = vector.load %arg12[%c0_31, %c0_32] : memref<16x128xf32, #tpu.memory_space<vmem>>, vector<16x128xf32>
    tpu.vector_store %arg12[%c0_31, %c0_32], %43 {strides = array<i32>} : memref<16x128xf32, #tpu.memory_space<vmem>>, vector<16x128xf32>,
    return
  }
  func.func @transform_0(%arg0: i32) -> (i32, i32) {
    %c0_i32 = arith.constant 0 : i32
    %c0_i32_0 = arith.constant 0 : i32
    return %arg0, %c0_i32 : i32, i32
  }
  func.func @transform_1(%arg0: i32) -> (i32, i32) {
    %c0_i32 = arith.constant 0 : i32
    %c0_i32_0 = arith.constant 0 : i32
    return %arg0, %c0_i32 : i32, i32
  }
  func.func @transform_2(%arg0: i32) -> (i32, i32) {
    %c0_i32 = arith.constant 0 : i32
    %c0_i32_0 = arith.constant 0 : i32
    %c0_i32_1 = arith.constant 0 : i32
    return %c0_i32, %c0_i32_0 : i32, i32
  }
  func.func @transform_3(%arg0: i32) -> (i32, i32) {
    %c0_i32 = arith.constant 0 : i32
    %c0_i32_0 = arith.constant 0 : i32
    %c0_i32_1 = arith.constant 0 : i32
    return %c0_i32, %c0_i32_0 : i32, i32
  }
  func.func @transform_4(%arg0: i32) -> (i32, i32) {
    %c0_i32 = arith.constant 0 : i32
    %c0_i32_0 = arith.constant 0 : i32
    %c0_i32_1 = arith.constant 0 : i32
    return %c0_i32, %c0_i32_0 : i32, i32
  }
  func.func @transform_5(%arg0: i32) -> (i32, i32) {
    %c0_i32 = arith.constant 0 : i32
    %c0_i32_0 = arith.constant 0 : i32
    %c0_i32_1 = arith.constant 0 : i32
    return %c0_i32, %c0_i32_0 : i32, i32
  }
  func.func @transform_6(%arg0: i32) -> (i32, i32) {
    %c0_i32 = arith.constant 0 : i32
    %c0_i32_0 = arith.constant 0 : i32
    %c0_i32_1 = arith.constant 0 : i32
    return %c0_i32, %c0_i32_0 : i32, i32
  }
  func.func @transform_7(%arg0: i32) -> (i32, i32) {
    %c0_i32 = arith.constant 0 : i32
    %c0_i32_0 = arith.constant 0 : i32
    %c0_i32_1 = arith.constant 0 : i32
    return %c0_i32, %c0_i32_0 : i32, i32
  }
  func.func @transform_8(%arg0: i32) -> (i32, i32) {
    %c0_i32 = arith.constant 0 : i32
    %c0_i32_0 = arith.constant 0 : i32
    %c0_i32_1 = arith.constant 0 : i32
    return %c0_i32, %c0_i32_0 : i32, i32
  }
  func.func @transform_9(%arg0: i32) -> (i32, i32) {
    %c0_i32 = arith.constant 0 : i32
    %c0_i32_0 = arith.constant 0 : i32
    %c0_i32_1 = arith.constant 0 : i32
    return %c0_i32, %c0_i32_0 : i32, i32
  }
  func.func @transform_10(%arg0: i32) -> (i32, i32) {
    %c0_i32 = arith.constant 0 : i32
    %c0_i32_0 = arith.constant 0 : i32
    %c0_i32_1 = arith.constant 0 : i32
    return %c0_i32, %c0_i32_0 : i32, i32
  }
  func.func @transform_11(%arg0: i32) -> (i32, i32) {
    %c0_i32 = arith.constant 0 : i32
    %c0_i32_0 = arith.constant 0 : i32
    return %arg0, %c0_i32 : i32, i32
  }
}

</mosaic_0001>

<bundles_post_ra>
// kernel: tpu_custom_call.1
= control target key start
LH: loop header
LB: loop body
LE: loop exit
PB: predicated region body
PF: predicated region fallthrough
CT: control target
= control target key end

     0   :  { %16 = vsyncpa [#allocation3], 0  ;;  %s4452_s0 = inlined_call_operand.hbm [shape: f32[16,256], index: 0, kind: input, shape index: {}]   ;;  %s4453_s1 = inlined_call_operand.vmem [shape: bf16[16,8], index: 1, kind: input, shape index: {}]   ;;  %s4454_s2 = inlined_call_operand.hbm [shape: bf16[256,512], index: 2, kind: input, shape index: {}]   ;;  %s4455_s3 = inlined_call_operand.vmem [shape: bf16[8,512], index: 3, kind: input, shape index: {}]   ;;  %s4456_s4 = inlined_call_operand.vmem [shape: f32[1,512], index: 4, kind: input, shape index: {}]   ;;  %s4457_s5 = inlined_call_operand.hbm [shape: bf16[512,512], index: 5, kind: input, shape index: {}]   ;;  %s4458_s6 = inlined_call_operand.vmem [shape: f32[1,512], index: 6, kind: input, shape index: {}]   ;;  %s4459_s7 = inlined_call_operand.hbm [shape: bf16[512,512], index: 7, kind: input, shape index: {}]   ;;  %s4460_s8 = inlined_call_operand.vmem [shape: f32[1,512], index: 8, kind: input, shape index: {}]   ;;  %s4461_s9 = inlined_call_operand.hbm [shape: bf16[512,128], index: 9, kind: input, shape index: {}]   ;;  %s4462_s10 = inlined_call_operand.vmem [shape: f32[1,128], index: 10, kind: input, shape index: {}]   ;;  %s4463_s11 = inlined_call_operand.hbm [shape: f32[16,128], index: 11, kind: output, shape index: {}]  }
   0x1   :  { %17 = vsyncpa [#allocation6], 0 }
   0x2   :  { %18 = vsyncpa [#allocation9], 0 }
   0x3   :  { %19 = vsyncpa [#allocation4], 0  ;;  %s4226_s17 = smov [#allocation5]   ;;  %s4227_s19 = smov [#allocation8]  }
   0x4   :  { %s39_s18 = sshll.u32 %s4226_s17, 4  ;;  %s69_s20 = sshll.u32 %s4227_s19, 4  ;;  %s40_s18 = int_to_ptr.vmem [resolvable:$true] %s39_s18  ;;  %s4299_s20 = int_to_ptr.vmem [resolvable:$true] %s69_s20 }
   0x5   :  { %s4086_s23 = scalar_lea.hbm %s4454_s2, 8192 }
   0x6   :  { %p4087_p0 = scmp.ne.s32.totalorder %s4454_s2, %s4086_s23  ;;  %p4090_p1 = scmp.lt.u32.totalorder %s4086_s23, %s4454_s2 }
   0x8   :  { %p4092_p2 = pnand %p4090_p1, %p4087_p0 }
   0xa   :  { %4095 = shalt.err (!%p4092_p2)
}
   0xb   :  { %s4096_s28 = scalar_lea.vmem %s40_s18, 8192  ;;  %p4101_p4 = scmp.lt.s32.totalorder %s40_s18, %s40_s18 }
   0xc   :  { %p4097_p3 = scmp.ne.s32.totalorder %s40_s18, %s4096_s28  ;;  %p4102_p5 = scmp.lt.s32.totalorder %s4096_s28, %s4096_s28 }
   0xe   :  { %p4103_p6 = por %p4102_p5, %p4101_p4 }
  0x10   :  { %p4104_p7 = pnand %p4103_p6, %p4097_p3 }
  0x12   :  { %4107 = shalt.err (!%p4104_p7)
}
  0x13   :  { %s4228_s29 = smov 256   ;;  %s4229_s30 = smov 16  }
  0x14   :  { %45 = dma.hbm_to_vmem [thread:$0]  %s4454_s2, 8192, %s40_s18, [#allocation6], %s4228_s29, %s4228_s29, %s4229_s30  }
  0x15   :  { %s4108_s16 = scalar_lea.hbm %s4459_s7, 16384 }
  0x16   :  { %p4109_p8 = scmp.ne.s32.totalorder %s4459_s7, %s4108_s16  ;;  %p4112_p9 = scmp.lt.u32.totalorder %s4108_s16, %s4459_s7 }
  0x18   :  { %p4114_p10 = pnand %p4112_p9, %p4109_p8 }
  0x1a   :  { %4117 = shalt.err (!%p4114_p10)
}
  0x1b   :  { %s4118_s23 = scalar_lea.vmem %s4299_s20, 16384  ;;  %p4123_p12 = scmp.lt.s32.totalorder %s4299_s20, %s4299_s20 }
  0x1c   :  { %p4119_p11 = scmp.ne.s32.totalorder %s4299_s20, %s4118_s23  ;;  %p4124_p13 = scmp.lt.s32.totalorder %s4118_s23, %s4118_s23 }
  0x1e   :  { %p4125_p0 = por %p4124_p13, %p4123_p12 }
  0x20   :  { %p4126_p1 = pnand %p4125_p0, %p4119_p11 }
  0x22   :  { %4129 = shalt.err (!%p4126_p1)
}
  0x23   :  { %75 = dma.hbm_to_vmem [thread:$0]  %s4459_s7, 16384, %s4299_s20, [#allocation9], %s4228_s29, %s4228_s29, %s4229_s30  }
  0x24   :  { %s4230_s24 = smov [#allocation2]   ;;  %s4231_s26 = smov [#allocation7]  }
  0x25   :  { %s25_s25 = sshll.u32 %s4230_s24, 4  ;;  %s55_s27 = sshll.u32 %s4231_s26, 4  ;;  %s26_s25 = int_to_ptr.vmem [resolvable:$true] %s25_s25  ;;  %s4336_s27 = int_to_ptr.vmem [resolvable:$true] %s55_s27 }
  0x26   :  { %s4130_s13 = scalar_lea.hbm %s4452_s0, 512 }
  0x27   :  { %p4131_p2 = scmp.ne.s32.totalorder %s4452_s0, %s4130_s13  ;;  %p4134_p3 = scmp.lt.u32.totalorder %s4130_s13, %s4452_s0 }
  0x29   :  { %p4136_p4 = pnand %p4134_p3, %p4131_p2 }
  0x2b   :  { %4139 = shalt.err (!%p4136_p4)
}
  0x2c   :  { %s4140_s7 = scalar_lea.vmem %s26_s25, 512  ;;  %p4145_p6 = scmp.lt.s32.totalorder %s26_s25, %s26_s25 }
  0x2d   :  { %p4141_p5 = scmp.ne.s32.totalorder %s26_s25, %s4140_s7  ;;  %p4146_p7 = scmp.lt.s32.totalorder %s4140_s7, %s4140_s7 }
  0x2f   :  { %p4147_p8 = por %p4146_p7, %p4145_p6 }
  0x31   :  { %p4148_p9 = pnand %p4147_p8, %p4141_p5 }
  0x33   :  { %4151 = shalt.err (!%p4148_p9)
}
  0x34   :  { %31 = dma.hbm_to_vmem [thread:$0]  %s4452_s0, 512, %s26_s25, [#allocation3], %s4228_s29, %s4228_s29, %s4229_s30  }
  0x35   :  { %s4152_s23 = scalar_lea.hbm %s4457_s5, 16384 }
  0x36   :  { %p4153_p10 = scmp.ne.s32.totalorder %s4457_s5, %s4152_s23  ;;  %p4156_p11 = scmp.lt.u32.totalorder %s4152_s23, %s4457_s5 }
  0x38   :  { %p4158_p12 = pnand %p4156_p11, %p4153_p10 }
  0x3a   :  { %4161 = shalt.err (!%p4158_p12)
}
  0x3b   :  { %s4162_s28 = scalar_lea.vmem %s4336_s27, 16384  ;;  %p4167_p0 = scmp.lt.s32.totalorder %s4336_s27, %s4336_s27 }
  0x3c   :  { %p4163_p13 = scmp.ne.s32.totalorder %s4336_s27, %s4162_s28  ;;  %p4168_p1 = scmp.lt.s32.totalorder %s4162_s28, %s4162_s28 }
  0x3e   :  { %p4169_p2 = por %p4168_p1, %p4167_p0 }
  0x40   :  { %p4170_p3 = pnand %p4169_p2, %p4163_p13 }
  0x42   :  { %4173 = shalt.err (!%p4170_p3)
}
  0x43   :  { %61 = dma.hbm_to_vmem [thread:$0]  %s4457_s5, 16384, %s4336_s27, [#allocation6], %s4228_s29, %s4228_s29, %s4229_s30  }
  0x44   :  { %s4232_s12 = smov [#allocation10]   ;;  %s4174_s16 = scalar_lea.hbm %s4461_s9, 4096 }
  0x45   :  { %s83_s13 = sshll.u32 %s4232_s12, 4  ;;  %p4175_p4 = scmp.ne.s32.totalorder %s4461_s9, %s4174_s16  ;;  %s84_s13 = int_to_ptr.vmem [resolvable:$true] %s83_s13 }
  0x46   :  { %p4178_p5 = scmp.lt.u32.totalorder %s4174_s16, %s4461_s9 }
  0x48   :  { %p4180_p6 = pnand %p4178_p5, %p4175_p4 }
  0x4a   :  { %4183 = shalt.err (!%p4180_p6)
}
  0x4b   :  { %s4184_s21 = scalar_lea.vmem %s84_s13, 4096  ;;  %p4189_p8 = scmp.lt.s32.totalorder %s84_s13, %s84_s13 }
  0x4c   :  { %p4185_p7 = scmp.ne.s32.totalorder %s84_s13, %s4184_s21  ;;  %p4190_p9 = scmp.lt.s32.totalorder %s4184_s21, %s4184_s21 }
  0x4e   :  { %p4191_p10 = por %p4190_p9, %p4189_p8 }
  0x50   :  { %p4192_p11 = pnand %p4191_p10, %p4185_p7 }
  0x52   :  { %4195 = shalt.err (!%p4192_p11)
}
  0x53   :  { %s4233_s5 = smov 64   ;;  %s4234_s29 = smov 4  }
  0x54   :  { %89 = dma.hbm_to_vmem [thread:$0]  %s4461_s9, 4096, %s84_s13, [#allocation9], %s4233_s5, %s4233_s5, %s4234_s29  }
  0x55   :  { %4218 = dma.done.wait [#allocation3], 512  }
  0x56   :  { %4219 = vsyncadd [#allocation3], 4294966784 }
  0x57   :  { %4220 = dma.done.wait [#allocation6], 24576  }
  0x58   :  { %4221 = vsyncadd [#allocation6], 4294942720 }
  0x59   :  { %4222 = dma.done.wait [#allocation9], 20480  }
  0x5a   :  { %4223 = vsyncadd [#allocation9], 4294946816  ;;  %v4235_v0 = vmov 0   ;;  %v180_v1 = vld [vmem:[%s4455_s3] sm:$0xff]  ;;  %vm201_vm0 = vcmask 1043456   ;;  %v181_v2 = vld [vmem:[%s4455_s3 + $0x8] sm:$0xff] }
  0x5b   :  { %246 = vmatprep.mubr.bf16.mxu0 %v4235_v0  ;;  %289 = vmatprep.mubr.bf16.mxu1 %v4235_v0  ;;  %v3112_v3 = vcombine.high %v180_v1, %v180_v1  ;;  %v3114_v4 = vcombine.high %v181_v2, %v181_v2  ;;  %v3111_v5 = vcombine.low %v180_v1, %v180_v1  ;;  %v3575_v7 = vld [vmem:[#allocation5 + $0x4] ss:$16 sps:$4 sm:$0xff]   ;;  %v3573_v8 = vld [vmem:[#allocation5] ss:$16 sps:$4 sm:$0xff]   ;;  %v3576_v9 = vld [vmem:[#allocation5 + $0x8] ss:$16 sps:$4 sm:$0xff]  }
  0x5c   :  { %v3113_v6 = vcombine.low %v181_v2, %v181_v2  ;;  %v3578_v12 = vld [vmem:[#allocation5 + $0xc] ss:$16 sps:$4 sm:$0xff]   ;;  %v3579_v13 = vld [vmem:[%s4453_s1] sm:$0xff]   ;;  %vm197_vm1 = vcmask 64512   ;;  %v3583_v17 = vld [vmem:[#allocation5 + $0x28] ss:$16 sps:$4 sm:$0xff]  }
  0x5d   :  { %3115 = vmatprep.subr.msk.bf16.mxu0 %vm201_vm0, %v3112_v3  ;;  %3117 = vmatprep.subr.msk.bf16.mxu1 %vm201_vm0, %v3114_v4  ;;  %v203_v10 = vsel %vm201_vm0, %v3111_v5, 0  ;;  %v3582_v14 = vld [vmem:[#allocation5 + $0x24] ss:$16 sps:$4 sm:$0xff]   ;;  %v3585_v15 = vld [vmem:[#allocation5 + $0x2c] ss:$16 sps:$4 sm:$0xff]   ;;  %s4236_s25 = smov [#allocation11]  }
  0x5e   :  { %v209_v11 = vsel %vm201_vm0, %v3113_v6, 0  ;;  %215 = vmatpush1.bf16.msra.mxu0 %v203_v10  ;;  %v3580_v16 = vld [vmem:[#allocation5 + $0x20] ss:$16 sps:$4 sm:$0xff]   ;;  %v3588_v18 = vld [vmem:[#allocation5 + $0x44] ss:$16 sps:$4 sm:$0xff]   ;;  %v109_v54 = vld [vmem:[#allocation2 + $0x8] sm:$0xff] }
  0x5f   :  { %258 = vmatpush1.bf16.msra.mxu1 %v209_v11  ;;  %620 = vmatprep.subr.bf16.mxu0 %v3575_v7  ;;  %v3591_v19 = vld [vmem:[#allocation5 + $0x4c] ss:$16 sps:$4 sm:$0xff]   ;;  %v3586_v20 = vld [vmem:[#allocation5 + $0x40] ss:$16 sps:$4 sm:$0xff]   ;;  %v3589_v21 = vld [vmem:[#allocation5 + $0x48] ss:$16 sps:$4 sm:$0xff]  }
  0x60   :  { %663 = vmatprep.subr.bf16.mxu1 %v3578_v12  ;;  %v3594_v22 = vld [vmem:[#allocation5 + $0x64] ss:$16 sps:$4 sm:$0xff]   ;;  %v3597_v23 = vld [vmem:[#allocation5 + $0x6c] ss:$16 sps:$4 sm:$0xff]   ;;  %v3592_v24 = vld [vmem:[#allocation5 + $0x60] ss:$16 sps:$4 sm:$0xff]  }
  0x61   :  { %3116 = vmatmul.mubr.msk.bf16.vlgmr.msra.gmra.mrb[0].mxu0 %vm197_vm1, %v3579_v13  ;;  %v3595_v25 = vld [vmem:[#allocation5 + $0x68] ss:$16 sps:$4 sm:$0xff]   ;;  %v3600_v26 = vld [vmem:[#allocation5 + $0x84] ss:$16 sps:$4 sm:$0xff]   ;;  %v3603_v27 = vld [vmem:[#allocation5 + $0x8c] ss:$16 sps:$4 sm:$0xff]  }
  0x62   :  { %3118 = vmatmul.mubr.msk.bf16.vlgmr.msra.gmra.mrb[0].mxu1 %vm197_vm1, %v3579_v13  ;;  %621 = vmatpush1.bf16.msra.mxu0 %v3573_v8  ;;  %v3598_v28 = vld [vmem:[#allocation5 + $0x80] ss:$16 sps:$4 sm:$0xff]   ;;  %v3601_v29 = vld [vmem:[#allocation5 + $0x88] ss:$16 sps:$4 sm:$0xff]   ;;  %v3606_v30 = vld [vmem:[#allocation5 + $0xa4] ss:$16 sps:$4 sm:$0xff]  }
  0x63   :  { %664 = vmatpush1.bf16.msra.mxu1 %v3576_v9  ;;  %622 = vmatprep.subr.bf16.mxu0 %v3582_v14  ;;  %v3609_v31 = vld [vmem:[#allocation5 + $0xac] ss:$16 sps:$4 sm:$0xff]   ;;  %v3604_v32 = vld [vmem:[#allocation5 + $0xa0] ss:$16 sps:$4 sm:$0xff]   ;;  %v3607_v33 = vld [vmem:[#allocation5 + $0xa8] ss:$16 sps:$4 sm:$0xff]  }
  0x64   :  { %665 = vmatprep.subr.bf16.mxu1 %v3585_v15  ;;  %v3612_v34 = vld [vmem:[#allocation5 + $0xc4] ss:$16 sps:$4 sm:$0xff]   ;;  %v3615_v35 = vld [vmem:[#allocation5 + $0xcc] ss:$16 sps:$4 sm:$0xff]   ;;  %v3610_v36 = vld [vmem:[#allocation5 + $0xc0] ss:$16 sps:$4 sm:$0xff]  }
  0x65   :  { %v3613_v37 = vld [vmem:[#allocation5 + $0xc8] ss:$16 sps:$4 sm:$0xff]   ;;  %v3618_v38 = vld [vmem:[#allocation5 + $0xe4] ss:$16 sps:$4 sm:$0xff]   ;;  %v3621_v39 = vld [vmem:[#allocation5 + $0xec] ss:$16 sps:$4 sm:$0xff]  }
  0x66   :  { %623 = vmatpush1.bf16.msra.mxu0 %v3580_v16  ;;  %v3616_v40 = vld [vmem:[#allocation5 + $0xe0] ss:$16 sps:$4 sm:$0xff]   ;;  %v3619_v41 = vld [vmem:[#allocation5 + $0xe8] ss:$16 sps:$4 sm:$0xff]   ;;  %v3624_v42 = vld [vmem:[#allocation5 + $0x104] ss:$16 sps:$4 sm:$0xff]  }
  0x67   :  { %666 = vmatpush1.bf16.msra.mxu1 %v3583_v17  ;;  %624 = vmatprep.subr.bf16.mxu0 %v3588_v18  ;;  %v3627_v43 = vld [vmem:[#allocation5 + $0x10c] ss:$16 sps:$4 sm:$0xff]   ;;  %v3622_v44 = vld [vmem:[#allocation5 + $0x100] ss:$16 sps:$4 sm:$0xff]   ;;  %v3625_v45 = vld [vmem:[#allocation5 + $0x108] ss:$16 sps:$4 sm:$0xff]  }
  0x68   :  { %667 = vmatprep.subr.bf16.mxu1 %v3591_v19  ;;  %v3630_v46 = vld [vmem:[#allocation5 + $0x124] ss:$16 sps:$4 sm:$0xff]   ;;  %v3633_v47 = vld [vmem:[#allocation5 + $0x12c] ss:$16 sps:$4 sm:$0xff]   ;;  %v3628_v48 = vld [vmem:[#allocation5 + $0x120] ss:$16 sps:$4 sm:$0xff]  }
  0x69   :  { %v3631_v49 = vld [vmem:[#allocation5 + $0x128] ss:$16 sps:$4 sm:$0xff]   ;;  %v3636_v50 = vld [vmem:[#allocation5 + $0x144] ss:$16 sps:$4 sm:$0xff]   ;;  %v3639_v51 = vld [vmem:[#allocation5 + $0x14c] ss:$16 sps:$4 sm:$0xff]  }
  0x6a   :  { %625 = vmatpush1.bf16.msra.mxu0 %v3586_v20  ;;  %v3634_v52 = vld [vmem:[#allocation5 + $0x140] ss:$16 sps:$4 sm:$0xff]   ;;  %v3637_v53 = vld [vmem:[#allocation5 + $0x148] ss:$16 sps:$4 sm:$0xff]   ;;  %v3642_v55 = vld [vmem:[#allocation5 + $0x164] ss:$16 sps:$4 sm:$0xff]  }
  0x6b   :  { %668 = vmatpush1.bf16.msra.mxu1 %v3589_v21  ;;  %626 = vmatprep.subr.bf16.mxu0 %v3594_v22  ;;  %v3645_v56 = vld [vmem:[#allocation5 + $0x16c] ss:$16 sps:$4 sm:$0xff]   ;;  %v3640_v59 = vld [vmem:[#allocation5 + $0x160] ss:$16 sps:$4 sm:$0xff]   ;;  %v3643_v60 = vld [vmem:[#allocation5 + $0x168] ss:$16 sps:$4 sm:$0xff]  }
  0x6c   :  { %669 = vmatprep.subr.bf16.mxu1 %v3597_v23  ;;  %v111_v57 = vld [vmem:[#allocation2 + $0x18] sm:$0xff]  ;;  %v3648_v61 = vld [vmem:[#allocation5 + $0x184] ss:$16 sps:$4 sm:$0xff]   ;;  %v3646_v63 = vld [vmem:[#allocation5 + $0x180] ss:$16 sps:$4 sm:$0xff]   ;;  %s3096_s12 = sshll.u32 %s4236_s25, 4  ;;  %s3097_s12 = int_to_ptr.vmem [resolvable:$true] %s3096_s12 }
  0x6d   :  { %v113_v58 = vpack.c.bf16 %v111_v57, %v109_v54  ;;  %v3651_v62 = vld [vmem:[#allocation5 + $0x18c] ss:$16 sps:$4 sm:$0xff]   ;;  %v3649_v0 = vld [vmem:[#allocation5 + $0x188] ss:$16 sps:$4 sm:$0xff]   ;;  %v3654_v1 = vld [vmem:[#allocation5 + $0x1a4] ss:$16 sps:$4 sm:$0xff]   ;;  %p4201_p13 = scmp.lt.s32.totalorder %s3097_s12, %s3097_s12 }
  0x6e   :  { %627 = vmatpush1.bf16.msra.mxu0 %v3592_v24  ;;  %v3657_v2 = vld [vmem:[#allocation5 + $0x1ac] ss:$16 sps:$4 sm:$0xff]   ;;  %v3652_v3 = vld [vmem:[#allocation5 + $0x1a0] ss:$16 sps:$4 sm:$0xff]   ;;  %v3655_v4 = vld [vmem:[#allocation5 + $0x1a8] ss:$16 sps:$4 sm:$0xff]  }
  0x6f   :  { %670 = vmatpush1.bf16.msra.mxu1 %v3595_v25  ;;  %628 = vmatprep.subr.bf16.mxu0 %v3600_v26  ;;  %v3660_v5 = vld [vmem:[#allocation5 + $0x1c4] ss:$16 sps:$4 sm:$0xff]   ;;  %v3663_v6 = vld [vmem:[#allocation5 + $0x1cc] ss:$16 sps:$4 sm:$0xff]   ;;  %v3658_v7 = vld [vmem:[#allocation5 + $0x1c0] ss:$16 sps:$4 sm:$0xff]  }
  0x70   :  { %671 = vmatprep.subr.bf16.mxu1 %v3603_v27  ;;  %652 = vmatprep.mubr.bf16.mxu0 %v113_v58  ;;  %v3661_v8 = vld [vmem:[#allocation5 + $0x1c8] ss:$16 sps:$4 sm:$0xff]   ;;  %v3666_v9 = vld [vmem:[#allocation5 + $0x1e4] ss:$16 sps:$4 sm:$0xff]   ;;  %v3669_v10 = vld [vmem:[#allocation5 + $0x1ec] ss:$16 sps:$4 sm:$0xff]  }
  0x71   :  { %695 = vmatprep.mubr.bf16.mxu1 %v113_v58  ;;  %v3664_v11 = vld [vmem:[#allocation5 + $0x1e0] ss:$16 sps:$4 sm:$0xff]   ;;  %v3667_v12 = vld [vmem:[#allocation5 + $0x1e8] ss:$16 sps:$4 sm:$0xff]   ;;  %v3672_v15 = vld [vmem:[#allocation7 + $0x4] ss:$16 sps:$4 sm:$0xff]  }
  0x72   :  { %629 = vmatpush1.bf16.msra.mxu0 %v3598_v28  ;;  %v108_v13 = vld [vmem:[#allocation2] sm:$0xff]  ;;  %v110_v14 = vld [vmem:[#allocation2 + $0x10] sm:$0xff]  ;;  %v3675_v16 = vld [vmem:[#allocation7 + $0xc] ss:$16 sps:$4 sm:$0xff]  }
  0x73   :  { %672 = vmatpush1.bf16.msra.mxu1 %v3601_v29  ;;  %630 = vmatprep.subr.bf16.mxu0 %v3606_v30  ;;  %v112_v17 = vpack.c.bf16 %v110_v14, %v108_v13  ;;  %v3670_v18 = vld [vmem:[#allocation7] ss:$16 sps:$4 sm:$0xff]   ;;  %v3673_v19 = vld [vmem:[#allocation7 + $0x8] ss:$16 sps:$4 sm:$0xff]   ;;  %v3678_v20 = vld [vmem:[#allocation7 + $0x24] ss:$16 sps:$4 sm:$0xff]  }
  0x74   :  { %673 = vmatprep.subr.bf16.mxu1 %v3609_v31  ;;  %v3681_v21 = vld [vmem:[#allocation7 + $0x2c] ss:$16 sps:$4 sm:$0xff]   ;;  %v3676_v22 = vld [vmem:[#allocation7 + $0x20] ss:$16 sps:$4 sm:$0xff]   ;;  %v3679_v23 = vld [vmem:[#allocation7 + $0x28] ss:$16 sps:$4 sm:$0xff]  }
  0x75   :  { %v3684_v24 = vld [vmem:[#allocation7 + $0x44] ss:$16 sps:$4 sm:$0xff]   ;;  %v3687_v25 = vld [vmem:[#allocation7 + $0x4c] ss:$16 sps:$4 sm:$0xff]   ;;  %v3682_v26 = vld [vmem:[#allocation7 + $0x40] ss:$16 sps:$4 sm:$0xff]  }
  0x76   :  { %631 = vmatpush1.bf16.msra.mxu0 %v3604_v32  ;;  %v3685_v27 = vld [vmem:[#allocation7 + $0x48] ss:$16 sps:$4 sm:$0xff]   ;;  %v3690_v28 = vld [vmem:[#allocation7 + $0x64] ss:$16 sps:$4 sm:$0xff]   ;;  %v3693_v29 = vld [vmem:[#allocation7 + $0x6c] ss:$16 sps:$4 sm:$0xff]  }
  0x77   :  { %674 = vmatpush1.bf16.msra.mxu1 %v3607_v33  ;;  %632 = vmatprep.subr.bf16.mxu0 %v3612_v34  ;;  %v3688_v30 = vld [vmem:[#allocation7 + $0x60] ss:$16 sps:$4 sm:$0xff]   ;;  %v3691_v31 = vld [vmem:[#allocation7 + $0x68] ss:$16 sps:$4 sm:$0xff]   ;;  %v3696_v32 = vld [vmem:[#allocation7 + $0x84] ss:$16 sps:$4 sm:$0xff]  }
  0x78   :  { %675 = vmatprep.subr.bf16.mxu1 %v3615_v35  ;;  %v3699_v33 = vld [vmem:[#allocation7 + $0x8c] ss:$16 sps:$4 sm:$0xff]   ;;  %v3694_v34 = vld [vmem:[#allocation7 + $0x80] ss:$16 sps:$4 sm:$0xff]   ;;  %v3697_v35 = vld [vmem:[#allocation7 + $0x88] ss:$16 sps:$4 sm:$0xff]  }
  0x79   :  { %v3724_v54 = vld [vmem:[#allocation7 + $0x120] ss:$16 sps:$4 sm:$0xff]   ;;  %v3735_v57 = vld [vmem:[#allocation7 + $0x14c] ss:$16 sps:$4 sm:$0xff]  }
  0x7a   :  { %633 = vmatpush1.bf16.msra.mxu0 %v3610_v36  ;;  %v3702_v36 = vld [vmem:[#allocation7 + $0xa4] ss:$16 sps:$4 sm:$0xff]   ;;  %v3730_v58 = vld [vmem:[#allocation7 + $0x140] ss:$16 sps:$4 sm:$0xff]   ;;  %v3765_v13 = vld [vmem:[#allocation7 + $0x1ec] ss:$16 sps:$4 sm:$0xff]  }
  0x7b   :  { %676 = vmatpush1.bf16.msra.mxu1 %v3613_v37  ;;  %634 = vmatprep.subr.bf16.mxu0 %v3618_v38  ;;  %v3705_v37 = vld [vmem:[#allocation7 + $0xac] ss:$16 sps:$4 sm:$0xff]   ;;  %v3700_v38 = vld [vmem:[#allocation7 + $0xa0] ss:$16 sps:$4 sm:$0xff]  }
  0x7c   :  { %677 = vmatprep.subr.bf16.mxu1 %v3621_v39  ;;  %v3703_v39 = vld [vmem:[#allocation7 + $0xa8] ss:$16 sps:$4 sm:$0xff]   ;;  %v3760_v14 = vld [vmem:[#allocation7 + $0x1e0] ss:$16 sps:$4 sm:$0xff]  }
  0x7e   :  { %635 = vmatpush1.bf16.msra.mxu0 %v3616_v40  ;;  %v3708_v40 = vld [vmem:[#allocation7 + $0xc4] ss:$16 sps:$4 sm:$0xff]  }
  0x7f   :  { %678 = vmatpush1.bf16.msra.mxu1 %v3619_v41  ;;  %636 = vmatprep.subr.bf16.mxu0 %v3624_v42  ;;  %v3711_v41 = vld [vmem:[#allocation7 + $0xcc] ss:$16 sps:$4 sm:$0xff]   ;;  %v3706_v42 = vld [vmem:[#allocation7 + $0xc0] ss:$16 sps:$4 sm:$0xff]  }
  0x80   :  { %679 = vmatprep.subr.bf16.mxu1 %v3627_v43  ;;  %v3709_v43 = vld [vmem:[#allocation7 + $0xc8] ss:$16 sps:$4 sm:$0xff]  }
  0x82   :  { %637 = vmatpush1.bf16.msra.mxu0 %v3622_v44  ;;  %v3714_v44 = vld [vmem:[#allocation7 + $0xe4] ss:$16 sps:$4 sm:$0xff]  }
  0x83   :  { %680 = vmatpush1.bf16.msra.mxu1 %v3625_v45  ;;  %638 = vmatprep.subr.bf16.mxu0 %v3630_v46  ;;  %v3717_v45 = vld [vmem:[#allocation7 + $0xec] ss:$16 sps:$4 sm:$0xff]   ;;  %v3712_v46 = vld [vmem:[#allocation7 + $0xe0] ss:$16 sps:$4 sm:$0xff]  }
  0x84   :  { %681 = vmatprep.subr.bf16.mxu1 %v3633_v47  ;;  %v3715_v47 = vld [vmem:[#allocation7 + $0xe8] ss:$16 sps:$4 sm:$0xff]  }
  0x86   :  { %639 = vmatpush1.bf16.msra.mxu0 %v3628_v48  ;;  %v3720_v48 = vld [vmem:[#allocation7 + $0x104] ss:$16 sps:$4 sm:$0xff]  }
  0x87   :  { %682 = vmatpush1.bf16.msra.mxu1 %v3631_v49  ;;  %640 = vmatprep.subr.bf16.mxu0 %v3636_v50  ;;  %v3723_v49 = vld [vmem:[#allocation7 + $0x10c] ss:$16 sps:$4 sm:$0xff]   ;;  %v3718_v50 = vld [vmem:[#allocation7 + $0x100] ss:$16 sps:$4 sm:$0xff]  }
  0x88   :  { %683 = vmatprep.subr.bf16.mxu1 %v3639_v51  ;;  %v3721_v51 = vld [vmem:[#allocation7 + $0x108] ss:$16 sps:$4 sm:$0xff]  }
  0x8a   :  { %641 = vmatpush1.bf16.msra.mxu0 %v3634_v52  ;;  %v3726_v52 = vld [vmem:[#allocation7 + $0x124] ss:$16 sps:$4 sm:$0xff]  }
  0x8b   :  { %684 = vmatpush1.bf16.msra.mxu1 %v3637_v53  ;;  %642 = vmatprep.subr.bf16.mxu0 %v3642_v55  ;;  %v3729_v53 = vld [vmem:[#allocation7 + $0x12c] ss:$16 sps:$4 sm:$0xff]   ;;  %v3727_v55 = vld [vmem:[#allocation7 + $0x128] ss:$16 sps:$4 sm:$0xff]  }
  0x8c   :  { %685 = vmatprep.subr.bf16.mxu1 %v3645_v56  ;;  %v3732_v56 = vld [vmem:[#allocation7 + $0x144] ss:$16 sps:$4 sm:$0xff]  }
  0x8e   :  { %643 = vmatpush1.bf16.msra.mxu0 %v3640_v59  ;;  %v3733_v59 = vld [vmem:[#allocation7 + $0x148] ss:$16 sps:$4 sm:$0xff]  }
  0x8f   :  { %686 = vmatpush1.bf16.msra.mxu1 %v3643_v60  ;;  %644 = vmatprep.subr.bf16.mxu0 %v3648_v61  ;;  %v3738_v60 = vld [vmem:[#allocation7 + $0x164] ss:$16 sps:$4 sm:$0xff]   ;;  %v3741_v61 = vld [vmem:[#allocation7 + $0x16c] ss:$16 sps:$4 sm:$0xff]  }
  0x90   :  { %687 = vmatprep.subr.bf16.mxu1 %v3651_v62  ;;  %v3736_v62 = vld [vmem:[#allocation7 + $0x160] ss:$16 sps:$4 sm:$0xff]  }
  0x92   :  { %645 = vmatpush1.bf16.msra.mxu0 %v3646_v63  ;;  %v3739_v63 = vld [vmem:[#allocation7 + $0x168] ss:$16 sps:$4 sm:$0xff]  }
  0x93   :  { %688 = vmatpush1.bf16.msra.mxu1 %v3649_v0  ;;  %646 = vmatprep.subr.bf16.mxu0 %v3654_v1  ;;  %v3744_v0 = vld [vmem:[#allocation7 + $0x184] ss:$16 sps:$4 sm:$0xff]   ;;  %v3747_v1 = vld [vmem:[#allocation7 + $0x18c] ss:$16 sps:$4 sm:$0xff]  }
  0x94   :  { %689 = vmatprep.subr.bf16.mxu1 %v3657_v2  ;;  %v3742_v2 = vld [vmem:[#allocation7 + $0x180] ss:$16 sps:$4 sm:$0xff]  }
  0x96   :  { %647 = vmatpush1.bf16.msra.mxu0 %v3652_v3  ;;  %v3745_v3 = vld [vmem:[#allocation7 + $0x188] ss:$16 sps:$4 sm:$0xff]  }
  0x97   :  { %690 = vmatpush1.bf16.msra.mxu1 %v3655_v4  ;;  %648 = vmatprep.subr.bf16.mxu0 %v3660_v5  ;;  %v3750_v4 = vld [vmem:[#allocation7 + $0x1a4] ss:$16 sps:$4 sm:$0xff]   ;;  %v3753_v5 = vld [vmem:[#allocation7 + $0x1ac] ss:$16 sps:$4 sm:$0xff]  }
  0x98   :  { %691 = vmatprep.subr.bf16.mxu1 %v3663_v6  ;;  %v3748_v6 = vld [vmem:[#allocation7 + $0x1a0] ss:$16 sps:$4 sm:$0xff]  }
  0x9a   :  { %649 = vmatpush1.bf16.msra.mxu0 %v3658_v7  ;;  %v3751_v7 = vld [vmem:[#allocation7 + $0x1a8] ss:$16 sps:$4 sm:$0xff]  }
  0x9b   :  { %692 = vmatpush1.bf16.msra.mxu1 %v3661_v8  ;;  %650 = vmatprep.subr.bf16.mxu0 %v3666_v9  ;;  %v3756_v8 = vld [vmem:[#allocation7 + $0x1c4] ss:$16 sps:$4 sm:$0xff]   ;;  %v3759_v9 = vld [vmem:[#allocation7 + $0x1cc] ss:$16 sps:$4 sm:$0xff]  }
  0x9c   :  { %693 = vmatprep.subr.bf16.mxu1 %v3669_v10  ;;  %v3754_v10 = vld [vmem:[#allocation7 + $0x1c0] ss:$16 sps:$4 sm:$0xff]  }
  0x9e   :  { %651 = vmatpush1.bf16.msra.mxu0 %v3664_v11  ;;  %v3757_v11 = vld [vmem:[#allocation7 + $0x1c8] ss:$16 sps:$4 sm:$0xff]  }
  0x9f   :  { %694 = vmatpush1.bf16.msra.mxu1 %v3667_v12  ;;  %1554 = vmatprep.subr.bf16.mxu0 %v3672_v15  ;;  %v3762_v12 = vld [vmem:[#allocation7 + $0x1e4] ss:$16 sps:$4 sm:$0xff]   ;;  %v3763_v15 = vld [vmem:[#allocation7 + $0x1e8] ss:$16 sps:$4 sm:$0xff]  }
  0xa0   :  { %1640 = vmatprep.subr.bf16.mxu1 %v3675_v16  ;;  %v3768_v16 = vld [vmem:[#allocation7 + $0x204] ss:$16 sps:$4 sm:$0xff]  }
  0xa1   :  { %653 = vmatmul.mubr.bf16.vlgmr.msra.gmra.mrb[0].mxu0 %v112_v17 }
  0xa2   :  { %696 = vmatmul.mubr.bf16.vlgmr.msra.gmra.mrb[0].mxu1 %v112_v17  ;;  %1555 = vmatpush1.bf16.msra.mxu0 %v3670_v18  ;;  %v3771_v17 = vld [vmem:[#allocation7 + $0x20c] ss:$16 sps:$4 sm:$0xff]   ;;  %v708_v18 = vlaneseq }
  0xa3   :  { %1641 = vmatpush1.bf16.msra.mxu1 %v3673_v19  ;;  %1556 = vmatprep.subr.bf16.mxu0 %v3678_v20 }
  0xa4   :  { %1642 = vmatprep.subr.bf16.mxu1 %v3681_v21  ;;  %v709_v19 = vshrl.u32 %v708_v18, 7  ;;  %v3793_v18 = vld [vmem:[#allocation7 + $0x288] ss:$16 sps:$4 sm:$0xff]  }
  0xa6   :  { %1557 = vmatpush1.bf16.msra.mxu0 %v3676_v22  ;;  %v4394_v20 = vsub.s32 0, %v709_v19  ;;  %v4396_v21 = vsub.s32 2, %v709_v19  ;;  %v706_v22 = vld [vmem:[%s4456_s4] sm:$0xf] }
  0xa7   :  { %1643 = vmatpush1.bf16.msra.mxu1 %v3679_v23  ;;  %1558 = vmatprep.subr.bf16.mxu0 %v3684_v24  ;;  %v4401_v23 = vsub.s32 1, %v709_v19  ;;  %v4403_v24 = vsub.s32 3, %v709_v19  ;;  %v3798_v19 = vld [vmem:[#allocation7 + $0x2a4] ss:$16 sps:$4 sm:$0xff]  }
  0xa8   :  { %1644 = vmatprep.subr.bf16.mxu1 %v3687_v25  ;;  %v711_v25 = vrot.slane %v706_v22, %v4394_v20 }
  0xaa   :  { %1559 = vmatpush1.bf16.msra.mxu0 %v3682_v26  ;;  %v719_v26 = vrot.slane %v706_v22, %v4396_v21 }
  0xab   :  { %1645 = vmatpush1.bf16.msra.mxu1 %v3685_v27  ;;  %1560 = vmatprep.subr.bf16.mxu0 %v3690_v28  ;;  %v715_v27 = vrot.slane %v706_v22, %v4401_v23  ;;  %v723_v28 = vrot.slane %v706_v22, %v4403_v24  ;;  %v3801_v22 = vld [vmem:[#allocation7 + $0x2ac] ss:$16 sps:$4 sm:$0xff]  }
  0xac   :  { %1646 = vmatprep.subr.bf16.mxu1 %v3693_v29 }
  0xae   :  { %1561 = vmatpush1.bf16.msra.mxu0 %v3688_v30 }
  0xaf   :  { %1647 = vmatpush1.bf16.msra.mxu1 %v3691_v31  ;;  %1562 = vmatprep.subr.bf16.mxu0 %v3696_v32 }
  0xb0   :  { %1648 = vmatprep.subr.bf16.mxu1 %v3699_v33 }
  0xb2   :  { %1563 = vmatpush1.bf16.msra.mxu0 %v3694_v34 }
  0xb3   :  { %1649 = vmatpush1.bf16.msra.mxu1 %v3697_v35  ;;  %1564 = vmatprep.subr.bf16.mxu0 %v3702_v36 }
  0xb4   :  { %1650 = vmatprep.subr.bf16.mxu1 %v3705_v37 }
  0xb6   :  { %1565 = vmatpush1.bf16.msra.mxu0 %v3700_v38 }
  0xb7   :  { %1651 = vmatpush1.bf16.msra.mxu1 %v3703_v39  ;;  %1566 = vmatprep.subr.bf16.mxu0 %v3708_v40 }
  0xb8   :  { %1652 = vmatprep.subr.bf16.mxu1 %v3711_v41 }
  0xba   :  { %1567 = vmatpush1.bf16.msra.mxu0 %v3706_v42 }
  0xbb   :  { %1653 = vmatpush1.bf16.msra.mxu1 %v3709_v43  ;;  %1568 = vmatprep.subr.bf16.mxu0 %v3714_v44 }
  0xbc   :  { %1654 = vmatprep.subr.bf16.mxu1 %v3717_v45 }
  0xbe   :  { %1569 = vmatpush1.bf16.msra.mxu0 %v3712_v46 }
  0xbf   :  { %1655 = vmatpush1.bf16.msra.mxu1 %v3715_v47  ;;  %1570 = vmatprep.subr.bf16.mxu0 %v3720_v48 }
  0xc0   :  { %1656 = vmatprep.subr.bf16.mxu1 %v3723_v49 }
  0xc2   :  { %1571 = vmatpush1.bf16.msra.mxu0 %v3718_v50 }
  0xc3   :  { %1657 = vmatpush1.bf16.msra.mxu1 %v3721_v51  ;;  %1572 = vmatprep.subr.bf16.mxu0 %v3726_v52 }
  0xc4   :  { %1658 = vmatprep.subr.bf16.mxu1 %v3729_v53 }
  0xc6   :  { %1573 = vmatpush1.bf16.msra.mxu0 %v3724_v54 }
  0xc7   :  { %1659 = vmatpush1.bf16.msra.mxu1 %v3727_v55  ;;  %1574 = vmatprep.subr.bf16.mxu0 %v3732_v56 }
  0xc8   :  { %1660 = vmatprep.subr.bf16.mxu1 %v3735_v57 }
  0xca   :  { %1575 = vmatpush1.bf16.msra.mxu0 %v3730_v58 }
  0xcb   :  { %1661 = vmatpush1.bf16.msra.mxu1 %v3733_v59  ;;  %1576 = vmatprep.subr.bf16.mxu0 %v3738_v60 }
  0xcc   :  { %1662 = vmatprep.subr.bf16.mxu1 %v3741_v61 }
  0xce   :  { %1577 = vmatpush1.bf16.msra.mxu0 %v3736_v62 }
  0xcf   :  { %1663 = vmatpush1.bf16.msra.mxu1 %v3739_v63  ;;  %1578 = vmatprep.subr.bf16.mxu0 %v3744_v0  ;;  %v3766_v0 = vld [vmem:[#allocation7 + $0x200] ss:$16 sps:$4 sm:$0xff]  }
  0xd0   :  { %1664 = vmatprep.subr.bf16.mxu1 %v3747_v1  ;;  %v3769_v1 = vld [vmem:[#allocation7 + $0x208] ss:$16 sps:$4 sm:$0xff]  }
  0xd2   :  { %1579 = vmatpush1.bf16.msra.mxu0 %v3742_v2 }
  0xd3   :  { %1665 = vmatpush1.bf16.msra.mxu1 %v3745_v3  ;;  %1580 = vmatprep.subr.bf16.mxu0 %v3750_v4  ;;  %v3774_v3 = vld [vmem:[#allocation7 + $0x224] ss:$16 sps:$4 sm:$0xff]   ;;  %v3777_v4 = vld [vmem:[#allocation7 + $0x22c] ss:$16 sps:$4 sm:$0xff]  }
  0xd4   :  { %1666 = vmatprep.subr.bf16.mxu1 %v3753_v5  ;;  %v3772_v5 = vld [vmem:[#allocation7 + $0x220] ss:$16 sps:$4 sm:$0xff]  }
  0xd6   :  { %1581 = vmatpush1.bf16.msra.mxu0 %v3748_v6  ;;  %v3775_v6 = vld [vmem:[#allocation7 + $0x228] ss:$16 sps:$4 sm:$0xff]  }
  0xd7   :  { %1667 = vmatpush1.bf16.msra.mxu1 %v3751_v7  ;;  %1582 = vmatprep.subr.bf16.mxu0 %v3756_v8  ;;  %v3780_v7 = vld [vmem:[#allocation7 + $0x244] ss:$16 sps:$4 sm:$0xff]   ;;  %v3783_v8 = vld [vmem:[#allocation7 + $0x24c] ss:$16 sps:$4 sm:$0xff]  }
  0xd8   :  { %1668 = vmatprep.subr.bf16.mxu1 %v3759_v9  ;;  %v3778_v9 = vld [vmem:[#allocation7 + $0x240] ss:$16 sps:$4 sm:$0xff]  }
  0xda   :  { %1583 = vmatpush1.bf16.msra.mxu0 %v3754_v10  ;;  %v3781_v10 = vld [vmem:[#allocation7 + $0x248] ss:$16 sps:$4 sm:$0xff]  }
  0xdb   :  { %1669 = vmatpush1.bf16.msra.mxu1 %v3757_v11  ;;  %1584 = vmatprep.subr.bf16.mxu0 %v3762_v12  ;;  %v3786_v11 = vld [vmem:[#allocation7 + $0x264] ss:$16 sps:$4 sm:$0xff]   ;;  %v3789_v12 = vld [vmem:[#allocation7 + $0x26c] ss:$16 sps:$4 sm:$0xff]  }
  0xdc   :  { %1670 = vmatprep.subr.bf16.mxu1 %v3765_v13  ;;  %v3784_v13 = vld [vmem:[#allocation7 + $0x260] ss:$16 sps:$4 sm:$0xff]  }
  0xde   :  { %1585 = vmatpush1.bf16.msra.mxu0 %v3760_v14  ;;  %v3787_v14 = vld [vmem:[#allocation7 + $0x268] ss:$16 sps:$4 sm:$0xff]  }
  0xdf   :  { %1671 = vmatpush1.bf16.msra.mxu1 %v3763_v15  ;;  %1597 = vmatprep.subr.bf16.mxu0 %v3768_v16  ;;  %v3792_v15 = vld [vmem:[#allocation7 + $0x284] ss:$16 sps:$4 sm:$0xff]   ;;  %v3795_v16 = vld [vmem:[#allocation7 + $0x28c] ss:$16 sps:$4 sm:$0xff]  }
  0xe0   :  { %1683 = vmatprep.subr.bf16.mxu1 %v3771_v17  ;;  %v3790_v17 = vld [vmem:[#allocation7 + $0x280] ss:$16 sps:$4 sm:$0xff]  }
 0x174   :  { %v654_v29 = vpop.f32.mrb[0].mxu0 }
 0x175   :  { %v697_v30 = vpop.f32.mrb[0].mxu1  ;;  %v728_v31 = vadd.f32 %v711_v25, %v654_v29  ;;  %v656_v33 = vpop.f32.mrb[1].mxu0  ;;  %v3802_v29 = vld [vmem:[#allocation7 + $0x2c0] ss:$16 sps:$4 sm:$0xff]  }
 0x176   :  { %v730_v32 = vadd.f32 %v719_v26, %v697_v30  ;;  %v699_v34 = vpop.f32.mrb[1].mxu1  ;;  %v729_v35 = vadd.f32 %v715_v27, %v656_v33  ;;  %v658_v37 = vpop.f32.mrb[2].mxu0  ;;  %v3805_v30 = vld [vmem:[#allocation7 + $0x2c8] ss:$16 sps:$4 sm:$0xff]   ;;  %v3808_v33 = vld [vmem:[#allocation7 + $0x2e0] ss:$16 sps:$4 sm:$0xff]  }
 0x177   :  { %v731_v36 = vadd.f32 %v723_v28, %v699_v34  ;;  %v701_v38 = vpop.f32.mrb[2].mxu1  ;;  %vm736_vm2 = vcmp.gt.f32.partialorder %v728_v31, 0.0  ;;  %v744_v39 = vmul.f32 0.2, %v728_v31  ;;  %v732_v43 = vadd.f32 %v711_v25, %v658_v37  ;;  %v660_v45 = vpop.f32.mrb[3].mxu0 }
 0x178   :  { %vm738_vm3 = vcmp.gt.f32.partialorder %v730_v32, 0.0  ;;  %v746_v40 = vmul.f32 0.2, %v730_v32  ;;  %vm737_vm4 = vcmp.gt.f32.partialorder %v729_v35, 0.0  ;;  %v745_v41 = vmul.f32 0.2, %v729_v35 }
 0x179   :  { %vm739_vm5 = vcmp.gt.f32.partialorder %v731_v36, 0.0  ;;  %v747_v42 = vmul.f32 0.2, %v731_v36  ;;  %v734_v44 = vadd.f32 %v719_v26, %v701_v38  ;;  %v703_v46 = vpop.f32.mrb[3].mxu1  ;;  %v752_v47 = vsel %vm736_vm2, %v728_v31, %v744_v39  ;;  %v3796_v25 = vld [vmem:[#allocation7 + $0x2a0] ss:$16 sps:$4 sm:$0xff]  }
 0x17a   :  { %v754_v48 = vsel %vm738_vm3, %v730_v32, %v746_v40  ;;  %v733_v49 = vadd.f32 %v715_v27, %v660_v45  ;;  %v735_v50 = vadd.f32 %v723_v28, %v703_v46  ;;  %vm740_vm6 = vcmp.gt.f32.partialorder %v732_v43, 0.0  ;;  %v3799_v26 = vld [vmem:[#allocation7 + $0x2a8] ss:$16 sps:$4 sm:$0xff]   ;;  %v3804_v27 = vld [vmem:[#allocation7 + $0x2c4] ss:$16 sps:$4 sm:$0xff]  }
 0x17b   :  { %v748_v51 = vmul.f32 0.2, %v732_v43  ;;  %vm742_vm7 = vcmp.gt.f32.partialorder %v734_v44, 0.0  ;;  %v750_v52 = vmul.f32 0.2, %v734_v44  ;;  %v753_v57 = vsel %vm737_vm4, %v729_v35, %v745_v41 }
 0x17c   :  { %vm741_vm8 = vcmp.gt.f32.partialorder %v733_v49, 0.0  ;;  %v749_v53 = vmul.f32 0.2, %v733_v49  ;;  %vm743_vm9 = vcmp.gt.f32.partialorder %v735_v50, 0.0  ;;  %v751_v54 = vmul.f32 0.2, %v735_v50 }
 0x17d   :  { %v756_v55 = vsel %vm740_vm6, %v732_v43, %v748_v51  ;;  %v758_v56 = vsel %vm742_vm7, %v734_v44, %v750_v52  ;;  %v755_v58 = vsel %vm739_vm5, %v731_v36, %v747_v42  ;;  %v3807_v28 = vld [vmem:[#allocation7 + $0x2cc] ss:$16 sps:$4 sm:$0xff]   ;;  %v3810_v31 = vld [vmem:[#allocation7 + $0x2e4] ss:$16 sps:$4 sm:$0xff]   ;;  %v3811_v34 = vld [vmem:[#allocation7 + $0x2e8] ss:$16 sps:$4 sm:$0xff]  }
 0x17e   :  { %v760_v59 = vpack.c.bf16 %v756_v55, %v752_v47  ;;  %v4411_v60 = vpack.c.bf16 %v758_v56, %v754_v48  ;;  %v757_v61 = vsel %vm741_vm8, %v733_v49, %v749_v53  ;;  %v759_v62 = vsel %vm743_vm9, %v735_v50, %v751_v54  ;;  %v3813_v32 = vld [vmem:[#allocation7 + $0x2ec] ss:$16 sps:$4 sm:$0xff]   ;;  %v3816_v35 = vld [vmem:[#allocation7 + $0x304] ss:$16 sps:$4 sm:$0xff]   ;;  %v3814_v37 = vld [vmem:[#allocation7 + $0x300] ss:$16 sps:$4 sm:$0xff]  }
 0x17f   :  { %v761_v63 = vpack.c.bf16 %v757_v61, %v753_v57  ;;  %v763_v2 = vpack.c.bf16 %v759_v62, %v755_v58  ;;  %v3819_v36 = vld [vmem:[#allocation7 + $0x30c] ss:$16 sps:$4 sm:$0xff]   ;;  %v3817_v38 = vld [vmem:[#allocation7 + $0x308] ss:$16 sps:$4 sm:$0xff]   ;;  %v3822_v39 = vld [vmem:[#allocation7 + $0x324] ss:$16 sps:$4 sm:$0xff]  }
 0x180   :  { %v3825_v40 = vld [vmem:[#allocation7 + $0x32c] ss:$16 sps:$4 sm:$0xff]   ;;  %v3820_v41 = vld [vmem:[#allocation7 + $0x320] ss:$16 sps:$4 sm:$0xff]   ;;  %v3823_v42 = vld [vmem:[#allocation7 + $0x328] ss:$16 sps:$4 sm:$0xff]  }
 0x181   :  { %1586 = vmatprep.mubr.bf16.mxu0 %v761_v63  ;;  %1672 = vmatprep.mubr.bf16.mxu1 %v761_v63  ;;  %v3828_v43 = vld [vmem:[#allocation7 + $0x344] ss:$16 sps:$4 sm:$0xff]   ;;  %v3831_v44 = vld [vmem:[#allocation7 + $0x34c] ss:$16 sps:$4 sm:$0xff]   ;;  %v3826_v45 = vld [vmem:[#allocation7 + $0x340] ss:$16 sps:$4 sm:$0xff]  }
 0x182   :  { %1587 = vmatmul.mubr.bf16.vlgmr.msra.gmra.mrb[4].mxu0 %v760_v59  ;;  %1673 = vmatmul.mubr.bf16.vlgmr.msra.gmra.mrb[4].mxu1 %v760_v59  ;;  %v3829_v46 = vld [vmem:[#allocation7 + $0x348] ss:$16 sps:$4 sm:$0xff]   ;;  %v3834_v47 = vld [vmem:[#allocation7 + $0x364] ss:$16 sps:$4 sm:$0xff]   ;;  %v3837_v48 = vld [vmem:[#allocation7 + $0x36c] ss:$16 sps:$4 sm:$0xff]  }
 0x183   :  { %1598 = vmatpush1.bf16.msra.mxu0 %v3766_v0  ;;  %1684 = vmatpush1.bf16.msra.mxu1 %v3769_v1  ;;  %v3832_v49 = vld [vmem:[#allocation7 + $0x360] ss:$16 sps:$4 sm:$0xff]   ;;  %v3835_v50 = vld [vmem:[#allocation7 + $0x368] ss:$16 sps:$4 sm:$0xff]   ;;  %v3840_v51 = vld [vmem:[#allocation7 + $0x384] ss:$16 sps:$4 sm:$0xff]  }
 0x184   :  { %1629 = vmatprep.mubr.bf16.mxu0 %v763_v2  ;;  %1715 = vmatprep.mubr.bf16.mxu1 %v763_v2  ;;  %v3843_v52 = vld [vmem:[#allocation7 + $0x38c] ss:$16 sps:$4 sm:$0xff]   ;;  %v3838_v53 = vld [vmem:[#allocation7 + $0x380] ss:$16 sps:$4 sm:$0xff]   ;;  %v3841_v54 = vld [vmem:[#allocation7 + $0x388] ss:$16 sps:$4 sm:$0xff]  }
 0x185   :  { %1599 = vmatprep.subr.bf16.mxu0 %v3774_v3  ;;  %1685 = vmatprep.subr.bf16.mxu1 %v3777_v4  ;;  %v3846_v55 = vld [vmem:[#allocation7 + $0x3a4] ss:$16 sps:$4 sm:$0xff]   ;;  %v3849_v56 = vld [vmem:[#allocation7 + $0x3ac] ss:$16 sps:$4 sm:$0xff]   ;;  %v3844_v57 = vld [vmem:[#allocation7 + $0x3a0] ss:$16 sps:$4 sm:$0xff]  }
 0x186   :  { %v3847_v58 = vld [vmem:[#allocation7 + $0x3a8] ss:$16 sps:$4 sm:$0xff]   ;;  %v3852_v59 = vld [vmem:[#allocation7 + $0x3c4] ss:$16 sps:$4 sm:$0xff]   ;;  %v3855_v61 = vld [vmem:[#allocation7 + $0x3cc] ss:$16 sps:$4 sm:$0xff]  }
 0x187   :  { %1600 = vmatpush1.bf16.msra.mxu0 %v3772_v5  ;;  %1686 = vmatpush1.bf16.msra.mxu1 %v3775_v6  ;;  %v3850_v62 = vld [vmem:[#allocation7 + $0x3c0] ss:$16 sps:$4 sm:$0xff]   ;;  %v3853_v63 = vld [vmem:[#allocation7 + $0x3c8] ss:$16 sps:$4 sm:$0xff]   ;;  %v3858_v0 = vld [vmem:[#allocation7 + $0x3e4] ss:$16 sps:$4 sm:$0xff]  }
 0x188   :  { %1601 = vmatprep.subr.bf16.mxu0 %v3780_v7  ;;  %1687 = vmatprep.subr.bf16.mxu1 %v3783_v8  ;;  %v3861_v1 = vld [vmem:[#allocation7 + $0x3ec] ss:$16 sps:$4 sm:$0xff]   ;;  %v3856_v2 = vld [vmem:[#allocation7 + $0x3e0] ss:$16 sps:$4 sm:$0xff]   ;;  %v3859_v3 = vld [vmem:[#allocation7 + $0x3e8] ss:$16 sps:$4 sm:$0xff]  }
 0x189   :  { %v3864_v4 = vld [vmem:[#allocation8 + $0x4] ss:$16 sps:$4 sm:$0xff]   ;;  %v3867_v5 = vld [vmem:[#allocation8 + $0xc] ss:$16 sps:$4 sm:$0xff]   ;;  %v3862_v6 = vld [vmem:[#allocation8] ss:$16 sps:$4 sm:$0xff]  }
 0x18a   :  { %v3865_v7 = vld [vmem:[#allocation8 + $0x8] ss:$16 sps:$4 sm:$0xff]   ;;  %v3870_v8 = vld [vmem:[#allocation8 + $0x24] ss:$16 sps:$4 sm:$0xff]  }
 0x18b   :  { %1602 = vmatpush1.bf16.msra.mxu0 %v3778_v9  ;;  %1688 = vmatpush1.bf16.msra.mxu1 %v3781_v10  ;;  %v3873_v9 = vld [vmem:[#allocation8 + $0x2c] ss:$16 sps:$4 sm:$0xff]   ;;  %v3868_v10 = vld [vmem:[#allocation8 + $0x20] ss:$16 sps:$4 sm:$0xff]  }
 0x18c   :  { %1603 = vmatprep.subr.bf16.mxu0 %v3786_v11  ;;  %1689 = vmatprep.subr.bf16.mxu1 %v3789_v12  ;;  %v3871_v11 = vld [vmem:[#allocation8 + $0x28] ss:$16 sps:$4 sm:$0xff]   ;;  %v3876_v12 = vld [vmem:[#allocation8 + $0x44] ss:$16 sps:$4 sm:$0xff]  }
 0x18f   :  { %1604 = vmatpush1.bf16.msra.mxu0 %v3784_v13  ;;  %1690 = vmatpush1.bf16.msra.mxu1 %v3787_v14  ;;  %v3879_v13 = vld [vmem:[#allocation8 + $0x4c] ss:$16 sps:$4 sm:$0xff]   ;;  %v3874_v14 = vld [vmem:[#allocation8 + $0x40] ss:$16 sps:$4 sm:$0xff]  }
 0x190   :  { %1605 = vmatprep.subr.bf16.mxu0 %v3792_v15  ;;  %1691 = vmatprep.subr.bf16.mxu1 %v3795_v16  ;;  %v3877_v15 = vld [vmem:[#allocation8 + $0x48] ss:$16 sps:$4 sm:$0xff]   ;;  %v3882_v16 = vld [vmem:[#allocation8 + $0x64] ss:$16 sps:$4 sm:$0xff]  }
 0x193   :  { %1606 = vmatpush1.bf16.msra.mxu0 %v3790_v17  ;;  %1692 = vmatpush1.bf16.msra.mxu1 %v3793_v18  ;;  %v3885_v17 = vld [vmem:[#allocation8 + $0x6c] ss:$16 sps:$4 sm:$0xff]   ;;  %v3880_v18 = vld [vmem:[#allocation8 + $0x60] ss:$16 sps:$4 sm:$0xff]  }
 0x194   :  { %1607 = vmatprep.subr.bf16.mxu0 %v3798_v19  ;;  %1693 = vmatprep.subr.bf16.mxu1 %v3801_v22  ;;  %v3888_v19 = vld [vmem:[#allocation8 + $0x84] ss:$16 sps:$4 sm:$0xff]   ;;  %v3891_v22 = vld [vmem:[#allocation8 + $0x8c] ss:$16 sps:$4 sm:$0xff]  }
 0x197   :  { %1608 = vmatpush1.bf16.msra.mxu0 %v3796_v25  ;;  %1694 = vmatpush1.bf16.msra.mxu1 %v3799_v26  ;;  %v3886_v25 = vld [vmem:[#allocation8 + $0x80] ss:$16 sps:$4 sm:$0xff]   ;;  %v3889_v26 = vld [vmem:[#allocation8 + $0x88] ss:$16 sps:$4 sm:$0xff]  }
 0x198   :  { %1609 = vmatprep.subr.bf16.mxu0 %v3804_v27  ;;  %1695 = vmatprep.subr.bf16.mxu1 %v3807_v28  ;;  %v3894_v27 = vld [vmem:[#allocation8 + $0xa4] ss:$16 sps:$4 sm:$0xff]   ;;  %v3897_v28 = vld [vmem:[#allocation8 + $0xac] ss:$16 sps:$4 sm:$0xff]  }
 0x19b   :  { %1610 = vmatpush1.bf16.msra.mxu0 %v3802_v29  ;;  %1696 = vmatpush1.bf16.msra.mxu1 %v3805_v30  ;;  %v3892_v29 = vld [vmem:[#allocation8 + $0xa0] ss:$16 sps:$4 sm:$0xff]   ;;  %v3895_v30 = vld [vmem:[#allocation8 + $0xa8] ss:$16 sps:$4 sm:$0xff]  }
 0x19c   :  { %1611 = vmatprep.subr.bf16.mxu0 %v3810_v31  ;;  %1697 = vmatprep.subr.bf16.mxu1 %v3813_v32  ;;  %v3900_v31 = vld [vmem:[#allocation8 + $0xc4] ss:$16 sps:$4 sm:$0xff]   ;;  %v3903_v32 = vld [vmem:[#allocation8 + $0xcc] ss:$16 sps:$4 sm:$0xff]  }
 0x19f   :  { %1612 = vmatpush1.bf16.msra.mxu0 %v3808_v33  ;;  %1698 = vmatpush1.bf16.msra.mxu1 %v3811_v34  ;;  %v3898_v33 = vld [vmem:[#allocation8 + $0xc0] ss:$16 sps:$4 sm:$0xff]   ;;  %v3901_v34 = vld [vmem:[#allocation8 + $0xc8] ss:$16 sps:$4 sm:$0xff]  }
 0x1a0   :  { %1613 = vmatprep.subr.bf16.mxu0 %v3816_v35  ;;  %1699 = vmatprep.subr.bf16.mxu1 %v3819_v36  ;;  %v3906_v35 = vld [vmem:[#allocation8 + $0xe4] ss:$16 sps:$4 sm:$0xff]   ;;  %v3909_v36 = vld [vmem:[#allocation8 + $0xec] ss:$16 sps:$4 sm:$0xff]  }
 0x1a3   :  { %1614 = vmatpush1.bf16.msra.mxu0 %v3814_v37  ;;  %1700 = vmatpush1.bf16.msra.mxu1 %v3817_v38  ;;  %v3904_v37 = vld [vmem:[#allocation8 + $0xe0] ss:$16 sps:$4 sm:$0xff]   ;;  %v3907_v38 = vld [vmem:[#allocation8 + $0xe8] ss:$16 sps:$4 sm:$0xff]  }
 0x1a4   :  { %1615 = vmatprep.subr.bf16.mxu0 %v3822_v39  ;;  %1701 = vmatprep.subr.bf16.mxu1 %v3825_v40  ;;  %v3912_v39 = vld [vmem:[#allocation8 + $0x104] ss:$16 sps:$4 sm:$0xff]   ;;  %v3915_v40 = vld [vmem:[#allocation8 + $0x10c] ss:$16 sps:$4 sm:$0xff]  }
 0x1a7   :  { %1616 = vmatpush1.bf16.msra.mxu0 %v3820_v41  ;;  %1702 = vmatpush1.bf16.msra.mxu1 %v3823_v42  ;;  %v3910_v41 = vld [vmem:[#allocation8 + $0x100] ss:$16 sps:$4 sm:$0xff]   ;;  %v3913_v42 = vld [vmem:[#allocation8 + $0x108] ss:$16 sps:$4 sm:$0xff]  }
 0x1a8   :  { %1617 = vmatprep.subr.bf16.mxu0 %v3828_v43  ;;  %1703 = vmatprep.subr.bf16.mxu1 %v3831_v44  ;;  %v3918_v43 = vld [vmem:[#allocation8 + $0x124] ss:$16 sps:$4 sm:$0xff]   ;;  %v3921_v44 = vld [vmem:[#allocation8 + $0x12c] ss:$16 sps:$4 sm:$0xff]  }
 0x1ab   :  { %1618 = vmatpush1.bf16.msra.mxu0 %v3826_v45  ;;  %1704 = vmatpush1.bf16.msra.mxu1 %v3829_v46  ;;  %v3916_v45 = vld [vmem:[#allocation8 + $0x120] ss:$16 sps:$4 sm:$0xff]   ;;  %v3919_v46 = vld [vmem:[#allocation8 + $0x128] ss:$16 sps:$4 sm:$0xff]  }
 0x1ac   :  { %1619 = vmatprep.subr.bf16.mxu0 %v3834_v47  ;;  %1705 = vmatprep.subr.bf16.mxu1 %v3837_v48  ;;  %v3924_v47 = vld [vmem:[#allocation8 + $0x144] ss:$16 sps:$4 sm:$0xff]   ;;  %v3927_v48 = vld [vmem:[#allocation8 + $0x14c] ss:$16 sps:$4 sm:$0xff]  }
 0x1af   :  { %1620 = vmatpush1.bf16.msra.mxu0 %v3832_v49  ;;  %1706 = vmatpush1.bf16.msra.mxu1 %v3835_v50  ;;  %v3922_v49 = vld [vmem:[#allocation8 + $0x140] ss:$16 sps:$4 sm:$0xff]   ;;  %v3925_v50 = vld [vmem:[#allocation8 + $0x148] ss:$16 sps:$4 sm:$0xff]  }
 0x1b0   :  { %1621 = vmatprep.subr.bf16.mxu0 %v3840_v51  ;;  %1707 = vmatprep.subr.bf16.mxu1 %v3843_v52  ;;  %v3930_v51 = vld [vmem:[#allocation8 + $0x164] ss:$16 sps:$4 sm:$0xff]   ;;  %v3933_v52 = vld [vmem:[#allocation8 + $0x16c] ss:$16 sps:$4 sm:$0xff]  }
 0x1b3   :  { %1622 = vmatpush1.bf16.msra.mxu0 %v3838_v53  ;;  %1708 = vmatpush1.bf16.msra.mxu1 %v3841_v54  ;;  %v3928_v53 = vld [vmem:[#allocation8 + $0x160] ss:$16 sps:$4 sm:$0xff]   ;;  %v3931_v54 = vld [vmem:[#allocation8 + $0x168] ss:$16 sps:$4 sm:$0xff]  }
 0x1b4   :  { %1623 = vmatprep.subr.bf16.mxu0 %v3846_v55  ;;  %1709 = vmatprep.subr.bf16.mxu1 %v3849_v56  ;;  %v3936_v55 = vld [vmem:[#allocation8 + $0x184] ss:$16 sps:$4 sm:$0xff]   ;;  %v3939_v56 = vld [vmem:[#allocation8 + $0x18c] ss:$16 sps:$4 sm:$0xff]  }
 0x1b7   :  { %1624 = vmatpush1.bf16.msra.mxu0 %v3844_v57  ;;  %1710 = vmatpush1.bf16.msra.mxu1 %v3847_v58  ;;  %v3934_v57 = vld [vmem:[#allocation8 + $0x180] ss:$16 sps:$4 sm:$0xff]   ;;  %v3937_v58 = vld [vmem:[#allocation8 + $0x188] ss:$16 sps:$4 sm:$0xff]  }
 0x1b8   :  { %1625 = vmatprep.subr.bf16.mxu0 %v3852_v59  ;;  %1711 = vmatprep.subr.bf16.mxu1 %v3855_v61  ;;  %v3942_v59 = vld [vmem:[#allocation8 + $0x1a4] ss:$16 sps:$4 sm:$0xff]   ;;  %v3945_v61 = vld [vmem:[#allocation8 + $0x1ac] ss:$16 sps:$4 sm:$0xff]  }
 0x1bb   :  { %1626 = vmatpush1.bf16.msra.mxu0 %v3850_v62  ;;  %1712 = vmatpush1.bf16.msra.mxu1 %v3853_v63  ;;  %v3940_v62 = vld [vmem:[#allocation8 + $0x1a0] ss:$16 sps:$4 sm:$0xff]   ;;  %v3943_v63 = vld [vmem:[#allocation8 + $0x1a8] ss:$16 sps:$4 sm:$0xff]  }
 0x1bc   :  { %1627 = vmatprep.subr.bf16.mxu0 %v3858_v0  ;;  %1713 = vmatprep.subr.bf16.mxu1 %v3861_v1  ;;  %v3948_v0 = vld [vmem:[#allocation8 + $0x1c4] ss:$16 sps:$4 sm:$0xff]   ;;  %v3951_v1 = vld [vmem:[#allocation8 + $0x1cc] ss:$16 sps:$4 sm:$0xff]  }
 0x1bf   :  { %1628 = vmatpush1.bf16.msra.mxu0 %v3856_v2  ;;  %1714 = vmatpush1.bf16.msra.mxu1 %v3859_v3  ;;  %v3946_v2 = vld [vmem:[#allocation8 + $0x1c0] ss:$16 sps:$4 sm:$0xff]   ;;  %v3949_v3 = vld [vmem:[#allocation8 + $0x1c8] ss:$16 sps:$4 sm:$0xff]  }
 0x1c0   :  { %2544 = vmatprep.subr.bf16.mxu0 %v3864_v4  ;;  %2630 = vmatprep.subr.bf16.mxu1 %v3867_v5  ;;  %v3954_v4 = vld [vmem:[#allocation8 + $0x1e4] ss:$16 sps:$4 sm:$0xff]   ;;  %v3957_v5 = vld [vmem:[#allocation8 + $0x1ec] ss:$16 sps:$4 sm:$0xff]  }
 0x1c2   :  { %1630 = vmatmul.mubr.bf16.vlgmr.msra.gmra.mrb[4].mxu0 %v4411_v60  ;;  %1716 = vmatmul.mubr.bf16.vlgmr.msra.gmra.mrb[4].mxu1 %v4411_v60  ;;  %v3883_v60 = vld [vmem:[#allocation8 + $0x68] ss:$16 sps:$4 sm:$0xff]  }
 0x1c3   :  { %2545 = vmatpush1.bf16.msra.mxu0 %v3862_v6  ;;  %2631 = vmatpush1.bf16.msra.mxu1 %v3865_v7  ;;  %v3952_v6 = vld [vmem:[#allocation8 + $0x1e0] ss:$16 sps:$4 sm:$0xff]   ;;  %v3955_v7 = vld [vmem:[#allocation8 + $0x1e8] ss:$16 sps:$4 sm:$0xff]  }
 0x1c4   :  { %2546 = vmatprep.subr.bf16.mxu0 %v3870_v8  ;;  %2632 = vmatprep.subr.bf16.mxu1 %v3873_v9  ;;  %v3960_v8 = vld [vmem:[#allocation8 + $0x204] ss:$16 sps:$4 sm:$0xff]   ;;  %v3963_v9 = vld [vmem:[#allocation8 + $0x20c] ss:$16 sps:$4 sm:$0xff]  }
 0x1c7   :  { %2547 = vmatpush1.bf16.msra.mxu0 %v3868_v10  ;;  %2633 = vmatpush1.bf16.msra.mxu1 %v3871_v11  ;;  %v892_v10 = vld [vmem:[%s4458_s6] sm:$0xf] }
 0x1c8   :  { %2548 = vmatprep.subr.bf16.mxu0 %v3876_v12  ;;  %2634 = vmatprep.subr.bf16.mxu1 %v3879_v13  ;;  %v897_v11 = vrot.slane %v892_v10, %v4394_v20  ;;  %v905_v12 = vrot.slane %v892_v10, %v4396_v21  ;;  %v901_v13 = vrot.slane %v892_v10, %v4401_v23 }
 0x1cb   :  { %2549 = vmatpush1.bf16.msra.mxu0 %v3874_v14  ;;  %2635 = vmatpush1.bf16.msra.mxu1 %v3877_v15  ;;  %v909_v14 = vrot.slane %v892_v10, %v4403_v24  ;;  %v3993_v10 = vld [vmem:[#allocation8 + $0x2ac] ss:$16 sps:$4 sm:$0xff]  }
 0x1cc   :  { %2550 = vmatprep.subr.bf16.mxu0 %v3882_v16  ;;  %2636 = vmatprep.subr.bf16.mxu1 %v3885_v17 }
 0x1cf   :  { %2551 = vmatpush1.bf16.msra.mxu0 %v3880_v18  ;;  %2637 = vmatpush1.bf16.msra.mxu1 %v3883_v60 }
 0x1d0   :  { %2552 = vmatprep.subr.bf16.mxu0 %v3888_v19  ;;  %2638 = vmatprep.subr.bf16.mxu1 %v3891_v22 }
 0x1d3   :  { %2553 = vmatpush1.bf16.msra.mxu0 %v3886_v25  ;;  %2639 = vmatpush1.bf16.msra.mxu1 %v3889_v26 }
 0x1d4   :  { %2554 = vmatprep.subr.bf16.mxu0 %v3894_v27  ;;  %2640 = vmatprep.subr.bf16.mxu1 %v3897_v28 }
 0x1d7   :  { %2555 = vmatpush1.bf16.msra.mxu0 %v3892_v29  ;;  %2641 = vmatpush1.bf16.msra.mxu1 %v3895_v30 }
 0x1d8   :  { %2556 = vmatprep.subr.bf16.mxu0 %v3900_v31  ;;  %2642 = vmatprep.subr.bf16.mxu1 %v3903_v32 }
 0x1db   :  { %2557 = vmatpush1.bf16.msra.mxu0 %v3898_v33  ;;  %2643 = vmatpush1.bf16.msra.mxu1 %v3901_v34 }
 0x1dc   :  { %2558 = vmatprep.subr.bf16.mxu0 %v3906_v35  ;;  %2644 = vmatprep.subr.bf16.mxu1 %v3909_v36 }
 0x1df   :  { %2559 = vmatpush1.bf16.msra.mxu0 %v3904_v37  ;;  %2645 = vmatpush1.bf16.msra.mxu1 %v3907_v38 }
 0x1e0   :  { %2560 = vmatprep.subr.bf16.mxu0 %v3912_v39  ;;  %2646 = vmatprep.subr.bf16.mxu1 %v3915_v40 }
 0x1e3   :  { %2561 = vmatpush1.bf16.msra.mxu0 %v3910_v41  ;;  %2647 = vmatpush1.bf16.msra.mxu1 %v3913_v42 }
 0x1e4   :  { %2562 = vmatprep.subr.bf16.mxu0 %v3918_v43  ;;  %2648 = vmatprep.subr.bf16.mxu1 %v3921_v44 }
 0x1e7   :  { %2563 = vmatpush1.bf16.msra.mxu0 %v3916_v45  ;;  %2649 = vmatpush1.bf16.msra.mxu1 %v3919_v46 }
 0x1e8   :  { %2564 = vmatprep.subr.bf16.mxu0 %v3924_v47  ;;  %2650 = vmatprep.subr.bf16.mxu1 %v3927_v48 }
 0x1eb   :  { %2565 = vmatpush1.bf16.msra.mxu0 %v3922_v49  ;;  %2651 = vmatpush1.bf16.msra.mxu1 %v3925_v50 }
 0x1ec   :  { %2566 = vmatprep.subr.bf16.mxu0 %v3930_v51  ;;  %2652 = vmatprep.subr.bf16.mxu1 %v3933_v52 }
 0x1ef   :  { %2567 = vmatpush1.bf16.msra.mxu0 %v3928_v53  ;;  %2653 = vmatpush1.bf16.msra.mxu1 %v3931_v54  ;;  %v3958_v53 = vld [vmem:[#allocation8 + $0x200] ss:$16 sps:$4 sm:$0xff]   ;;  %v3961_v54 = vld [vmem:[#allocation8 + $0x208] ss:$16 sps:$4 sm:$0xff]  }
 0x1f0   :  { %2568 = vmatprep.subr.bf16.mxu0 %v3936_v55  ;;  %2654 = vmatprep.subr.bf16.mxu1 %v3939_v56  ;;  %v3966_v56 = vld [vmem:[#allocation8 + $0x224] ss:$16 sps:$4 sm:$0xff]  }
 0x1f3   :  { %2569 = vmatpush1.bf16.msra.mxu0 %v3934_v57  ;;  %2655 = vmatpush1.bf16.msra.mxu1 %v3937_v58  ;;  %v3969_v57 = vld [vmem:[#allocation8 + $0x22c] ss:$16 sps:$4 sm:$0xff]   ;;  %v3964_v58 = vld [vmem:[#allocation8 + $0x220] ss:$16 sps:$4 sm:$0xff]  }
 0x1f4   :  { %2570 = vmatprep.subr.bf16.mxu0 %v3942_v59  ;;  %2656 = vmatprep.subr.bf16.mxu1 %v3945_v61  ;;  %v3967_v59 = vld [vmem:[#allocation8 + $0x228] ss:$16 sps:$4 sm:$0xff]   ;;  %v3972_v61 = vld [vmem:[#allocation8 + $0x244] ss:$16 sps:$4 sm:$0xff]  }
 0x1f7   :  { %2571 = vmatpush1.bf16.msra.mxu0 %v3940_v62  ;;  %2657 = vmatpush1.bf16.msra.mxu1 %v3943_v63  ;;  %v3975_v62 = vld [vmem:[#allocation8 + $0x24c] ss:$16 sps:$4 sm:$0xff]   ;;  %v3970_v63 = vld [vmem:[#allocation8 + $0x240] ss:$16 sps:$4 sm:$0xff]  }
 0x1f8   :  { %2572 = vmatprep.subr.bf16.mxu0 %v3948_v0  ;;  %2658 = vmatprep.subr.bf16.mxu1 %v3951_v1  ;;  %v3973_v0 = vld [vmem:[#allocation8 + $0x248] ss:$16 sps:$4 sm:$0xff]   ;;  %v3978_v1 = vld [vmem:[#allocation8 + $0x264] ss:$16 sps:$4 sm:$0xff]  }
 0x1fb   :  { %2573 = vmatpush1.bf16.msra.mxu0 %v3946_v2  ;;  %2659 = vmatpush1.bf16.msra.mxu1 %v3949_v3  ;;  %v3981_v2 = vld [vmem:[#allocation8 + $0x26c] ss:$16 sps:$4 sm:$0xff]   ;;  %v3976_v3 = vld [vmem:[#allocation8 + $0x260] ss:$16 sps:$4 sm:$0xff]  }
 0x1fc   :  { %2574 = vmatprep.subr.bf16.mxu0 %v3954_v4  ;;  %2660 = vmatprep.subr.bf16.mxu1 %v3957_v5  ;;  %v3979_v4 = vld [vmem:[#allocation8 + $0x268] ss:$16 sps:$4 sm:$0xff]   ;;  %v3984_v5 = vld [vmem:[#allocation8 + $0x284] ss:$16 sps:$4 sm:$0xff]  }
 0x1ff   :  { %2575 = vmatpush1.bf16.msra.mxu0 %v3952_v6  ;;  %2661 = vmatpush1.bf16.msra.mxu1 %v3955_v7  ;;  %v3987_v6 = vld [vmem:[#allocation8 + $0x28c] ss:$16 sps:$4 sm:$0xff]   ;;  %v3982_v7 = vld [vmem:[#allocation8 + $0x280] ss:$16 sps:$4 sm:$0xff]  }
 0x200   :  { %2587 = vmatprep.subr.bf16.mxu0 %v3960_v8  ;;  %2673 = vmatprep.subr.bf16.mxu1 %v3963_v9  ;;  %v3985_v8 = vld [vmem:[#allocation8 + $0x288] ss:$16 sps:$4 sm:$0xff]   ;;  %v3990_v9 = vld [vmem:[#allocation8 + $0x2a4] ss:$16 sps:$4 sm:$0xff]  }
 0x295   :  { %v1631_v15 = vpop.f32.mrb[4].mxu0  ;;  %v1717_v16 = vpop.f32.mrb[4].mxu1 }
 0x296   :  { %v3516_v17 = vadd.f32 %v1631_v15, %v897_v11  ;;  %v3520_v18 = vadd.f32 %v1717_v16, %v905_v12  ;;  %v1633_v60 = vpop.f32.mrb[5].mxu0  ;;  %v1719_v19 = vpop.f32.mrb[5].mxu1  ;;  %v3994_v15 = vld [vmem:[#allocation8 + $0x2c0] ss:$16 sps:$4 sm:$0xff]   ;;  %v3997_v16 = vld [vmem:[#allocation8 + $0x2c8] ss:$16 sps:$4 sm:$0xff]  }
 0x297   :  { %v3517_v22 = vadd.f32 %v1633_v60, %v901_v13  ;;  %v3521_v25 = vadd.f32 %v1719_v19, %v909_v14  ;;  %v1635_v26 = vpop.f32.mrb[6].mxu0  ;;  %v1721_v27 = vpop.f32.mrb[6].mxu1  ;;  %v4000_v60 = vld [vmem:[#allocation8 + $0x2e0] ss:$16 sps:$4 sm:$0xff]   ;;  %v4003_v19 = vld [vmem:[#allocation8 + $0x2e8] ss:$16 sps:$4 sm:$0xff]  }
 0x298   :  { %vm1726_vm10 = vcmp.gt.f32.partialorder %v3516_v17, 0.0  ;;  %v1734_v28 = vmul.f32 0.2, %v3516_v17  ;;  %vm1728_vm11 = vcmp.gt.f32.partialorder %v3520_v18, 0.0  ;;  %v1736_v29 = vmul.f32 0.2, %v3520_v18 }
 0x299   :  { %vm1727_vm12 = vcmp.gt.f32.partialorder %v3517_v22, 0.0  ;;  %v1735_v30 = vmul.f32 0.2, %v3517_v22  ;;  %vm1729_vm13 = vcmp.gt.f32.partialorder %v3521_v25, 0.0  ;;  %v1737_v31 = vmul.f32 0.2, %v3521_v25 }
 0x29a   :  { %v3518_v32 = vadd.f32 %v1635_v26, %v897_v11  ;;  %v3522_v33 = vadd.f32 %v1721_v27, %v905_v12  ;;  %v1637_v34 = vpop.f32.mrb[7].mxu0  ;;  %v1723_v35 = vpop.f32.mrb[7].mxu1  ;;  %v1742_v36 = vsel %vm1726_vm10, %v3516_v17, %v1734_v28  ;;  %v1744_v37 = vsel %vm1728_vm11, %v3520_v18, %v1736_v29  ;;  %v3988_v11 = vld [vmem:[#allocation8 + $0x2a0] ss:$16 sps:$4 sm:$0xff]   ;;  %v3991_v12 = vld [vmem:[#allocation8 + $0x2a8] ss:$16 sps:$4 sm:$0xff]  }
 0x29b   :  { %v3519_v38 = vadd.f32 %v1637_v34, %v901_v13  ;;  %v3523_v39 = vadd.f32 %v1723_v35, %v909_v14  ;;  %v1743_v46 = vsel %vm1727_vm12, %v3517_v22, %v1735_v30  ;;  %v1745_v47 = vsel %vm1729_vm13, %v3521_v25, %v1737_v31  ;;  %v3996_v13 = vld [vmem:[#allocation8 + $0x2c4] ss:$16 sps:$4 sm:$0xff]   ;;  %v3999_v14 = vld [vmem:[#allocation8 + $0x2cc] ss:$16 sps:$4 sm:$0xff]   ;;  %v4006_v26 = vld [vmem:[#allocation8 + $0x300] ss:$16 sps:$4 sm:$0xff]  }
 0x29c   :  { %vm1730_vm14 = vcmp.gt.f32.partialorder %v3518_v32, 0.0  ;;  %v1738_v40 = vmul.f32 0.2, %v3518_v32  ;;  %vm1732_vm15 = vcmp.gt.f32.partialorder %v3522_v33, 0.0  ;;  %v1740_v41 = vmul.f32 0.2, %v3522_v33 }
 0x29d   :  { %vm1731_vm0 = vcmp.gt.f32.partialorder %v3519_v38, 0.0  ;;  %v1739_v42 = vmul.f32 0.2, %v3519_v38  ;;  %vm1733_vm1 = vcmp.gt.f32.partialorder %v3523_v39, 0.0  ;;  %v1741_v43 = vmul.f32 0.2, %v3523_v39 }
 0x29e   :  { %v1746_v44 = vsel %vm1730_vm14, %v3518_v32, %v1738_v40  ;;  %v1748_v45 = vsel %vm1732_vm15, %v3522_v33, %v1740_v41  ;;  %v4002_v17 = vld [vmem:[#allocation8 + $0x2e4] ss:$16 sps:$4 sm:$0xff]   ;;  %v4005_v18 = vld [vmem:[#allocation8 + $0x2ec] ss:$16 sps:$4 sm:$0xff]   ;;  %v4009_v27 = vld [vmem:[#allocation8 + $0x308] ss:$16 sps:$4 sm:$0xff]  }
 0x29f   :  { %v1750_v48 = vpack.c.bf16 %v1746_v44, %v1742_v36  ;;  %v4424_v49 = vpack.c.bf16 %v1748_v45, %v1744_v37  ;;  %v1747_v50 = vsel %vm1731_vm0, %v3519_v38, %v1739_v42  ;;  %v1749_v51 = vsel %vm1733_vm1, %v3523_v39, %v1741_v43  ;;  %v4008_v22 = vld [vmem:[#allocation8 + $0x304] ss:$16 sps:$4 sm:$0xff]   ;;  %v4011_v25 = vld [vmem:[#allocation8 + $0x30c] ss:$16 sps:$4 sm:$0xff]   ;;  %v4012_v30 = vld [vmem:[#allocation8 + $0x320] ss:$16 sps:$4 sm:$0xff]  }
 0x2a0   :  { %v1751_v52 = vpack.c.bf16 %v1747_v50, %v1743_v46  ;;  %v1753_v55 = vpack.c.bf16 %v1749_v51, %v1745_v47  ;;  %v4014_v28 = vld [vmem:[#allocation8 + $0x324] ss:$16 sps:$4 sm:$0xff]   ;;  %v4017_v29 = vld [vmem:[#allocation8 + $0x32c] ss:$16 sps:$4 sm:$0xff]   ;;  %v4015_v31 = vld [vmem:[#allocation8 + $0x328] ss:$16 sps:$4 sm:$0xff]  }
 0x2a1   :  { %v4020_v32 = vld [vmem:[#allocation8 + $0x344] ss:$16 sps:$4 sm:$0xff]   ;;  %v4023_v33 = vld [vmem:[#allocation8 + $0x34c] ss:$16 sps:$4 sm:$0xff]   ;;  %v4018_v34 = vld [vmem:[#allocation8 + $0x340] ss:$16 sps:$4 sm:$0xff]  }
 0x2a2   :  { %2576 = vmatprep.mubr.bf16.mxu0 %v1751_v52  ;;  %2662 = vmatprep.mubr.bf16.mxu1 %v1751_v52  ;;  %v4021_v35 = vld [vmem:[#allocation8 + $0x348] ss:$16 sps:$4 sm:$0xff]   ;;  %v4026_v36 = vld [vmem:[#allocation8 + $0x364] ss:$16 sps:$4 sm:$0xff]   ;;  %v4029_v37 = vld [vmem:[#allocation8 + $0x36c] ss:$16 sps:$4 sm:$0xff]  }
 0x2a3   :  { %2577 = vmatmul.mubr.bf16.vlgmr.msra.gmra.mrb[8].mxu0 %v1750_v48  ;;  %2663 = vmatmul.mubr.bf16.vlgmr.msra.gmra.mrb[8].mxu1 %v1750_v48  ;;  %v4024_v38 = vld [vmem:[#allocation8 + $0x360] ss:$16 sps:$4 sm:$0xff]   ;;  %v4027_v39 = vld [vmem:[#allocation8 + $0x368] ss:$16 sps:$4 sm:$0xff]   ;;  %v4032_v40 = vld [vmem:[#allocation8 + $0x384] ss:$16 sps:$4 sm:$0xff]  }
 0x2a4   :  { %2588 = vmatpush1.bf16.msra.mxu0 %v3958_v53  ;;  %2674 = vmatpush1.bf16.msra.mxu1 %v3961_v54  ;;  %v4035_v41 = vld [vmem:[#allocation8 + $0x38c] ss:$16 sps:$4 sm:$0xff]   ;;  %v4030_v42 = vld [vmem:[#allocation8 + $0x380] ss:$16 sps:$4 sm:$0xff]   ;;  %v4033_v43 = vld [vmem:[#allocation8 + $0x388] ss:$16 sps:$4 sm:$0xff]  }
 0x2a5   :  { %2619 = vmatprep.mubr.bf16.mxu0 %v1753_v55  ;;  %2705 = vmatprep.mubr.bf16.mxu1 %v1753_v55  ;;  %v4038_v44 = vld [vmem:[#allocation8 + $0x3a4] ss:$16 sps:$4 sm:$0xff]   ;;  %v4041_v45 = vld [vmem:[#allocation8 + $0x3ac] ss:$16 sps:$4 sm:$0xff]   ;;  %v4036_v46 = vld [vmem:[#allocation8 + $0x3a0] ss:$16 sps:$4 sm:$0xff]  }
 0x2a6   :  { %2589 = vmatprep.subr.bf16.mxu0 %v3966_v56  ;;  %2675 = vmatprep.subr.bf16.mxu1 %v3969_v57  ;;  %v4039_v47 = vld [vmem:[#allocation8 + $0x3a8] ss:$16 sps:$4 sm:$0xff]   ;;  %v4044_v48 = vld [vmem:[#allocation8 + $0x3c4] ss:$16 sps:$4 sm:$0xff]   ;;  %v4047_v50 = vld [vmem:[#allocation8 + $0x3cc] ss:$16 sps:$4 sm:$0xff]  }
 0x2a7   :  { %v4042_v51 = vld [vmem:[#allocation8 + $0x3c0] ss:$16 sps:$4 sm:$0xff]   ;;  %v4045_v52 = vld [vmem:[#allocation8 + $0x3c8] ss:$16 sps:$4 sm:$0xff]   ;;  %v4050_v53 = vld [vmem:[#allocation8 + $0x3e4] ss:$16 sps:$4 sm:$0xff]  }
 0x2a8   :  { %2590 = vmatpush1.bf16.msra.mxu0 %v3964_v58  ;;  %2676 = vmatpush1.bf16.msra.mxu1 %v3967_v59  ;;  %v4053_v54 = vld [vmem:[#allocation8 + $0x3ec] ss:$16 sps:$4 sm:$0xff]   ;;  %v4048_v55 = vld [vmem:[#allocation8 + $0x3e0] ss:$16 sps:$4 sm:$0xff]   ;;  %v4051_v56 = vld [vmem:[#allocation8 + $0x3e8] ss:$16 sps:$4 sm:$0xff]  }
 0x2a9   :  { %2591 = vmatprep.subr.bf16.mxu0 %v3972_v61  ;;  %2677 = vmatprep.subr.bf16.mxu1 %v3975_v62  ;;  %v4054_v57 = vld [vmem:[#allocation10 + $0x40] sm:$0xff]   ;;  %v4058_v62 = vld [vmem:[#allocation10 + $0x48] sm:$0xff]  }
 0x2aa   :  { %v4055_v58 = vld [vmem:[#allocation10 + $0xc0] sm:$0xff]  }
 0x2ab   :  { %v4056_v59 = vld [vmem:[#allocation10] sm:$0xff]  }
 0x2ac   :  { %2592 = vmatpush1.bf16.msra.mxu0 %v3970_v63  ;;  %2678 = vmatpush1.bf16.msra.mxu1 %v3973_v0  ;;  %v4057_v61 = vld [vmem:[#allocation10 + $0x80] sm:$0xff]   ;;  %v4059_v63 = vld [vmem:[#allocation10 + $0xc8] sm:$0xff]  }
 0x2ad   :  { %2593 = vmatprep.subr.bf16.mxu0 %v3978_v1  ;;  %2679 = vmatprep.subr.bf16.mxu1 %v3981_v2  ;;  %v4060_v0 = vld [vmem:[#allocation10 + $0x8] sm:$0xff]   ;;  %v4062_v2 = vld [vmem:[#allocation10 + $0x50] sm:$0xff]  }
 0x2ae   :  { %v4061_v1 = vld [vmem:[#allocation10 + $0x88] sm:$0xff]  }
 0x2b0   :  { %2594 = vmatpush1.bf16.msra.mxu0 %v3976_v3  ;;  %2680 = vmatpush1.bf16.msra.mxu1 %v3979_v4  ;;  %v4063_v3 = vld [vmem:[#allocation10 + $0xd0] sm:$0xff]  }
 0x2b1   :  { %2595 = vmatprep.subr.bf16.mxu0 %v3984_v5  ;;  %2681 = vmatprep.subr.bf16.mxu1 %v3987_v6  ;;  %v4064_v4 = vld [vmem:[#allocation10 + $0x10] sm:$0xff]   ;;  %v4066_v6 = vld [vmem:[#allocation10 + $0x58] sm:$0xff]  }
 0x2b2   :  { %v4065_v5 = vld [vmem:[#allocation10 + $0x90] sm:$0xff]  }
 0x2b4   :  { %2596 = vmatpush1.bf16.msra.mxu0 %v3982_v7  ;;  %2682 = vmatpush1.bf16.msra.mxu1 %v3985_v8  ;;  %v4067_v7 = vld [vmem:[#allocation10 + $0xd8] sm:$0xff]  }
 0x2b5   :  { %2597 = vmatprep.subr.bf16.mxu0 %v3990_v9  ;;  %2683 = vmatprep.subr.bf16.mxu1 %v3993_v10  ;;  %v4068_v8 = vld [vmem:[#allocation10 + $0x18] sm:$0xff]   ;;  %v4070_v9 = vld [vmem:[#allocation10 + $0x60] sm:$0xff]  }
 0x2b6   :  { %v4071_v10 = vld [vmem:[#allocation10 + $0xe0] sm:$0xff]  }
 0x2b8   :  { %2598 = vmatpush1.bf16.msra.mxu0 %v3988_v11  ;;  %2684 = vmatpush1.bf16.msra.mxu1 %v3991_v12  ;;  %v4072_v11 = vld [vmem:[#allocation10 + $0x20] sm:$0xff]  }
 0x2b9   :  { %2599 = vmatprep.subr.bf16.mxu0 %v3996_v13  ;;  %2685 = vmatprep.subr.bf16.mxu1 %v3999_v14  ;;  %v4073_v12 = vld [vmem:[#allocation10 + $0xa0] sm:$0xff]   ;;  %v4074_v13 = vld [vmem:[#allocation10 + $0x68] sm:$0xff]  }
 0x2ba   :  { %v4075_v14 = vld [vmem:[#allocation10 + $0xe8] sm:$0xff]  }
 0x2bc   :  { %2600 = vmatpush1.bf16.msra.mxu0 %v3994_v15  ;;  %2686 = vmatpush1.bf16.msra.mxu1 %v3997_v16  ;;  %v4076_v15 = vld [vmem:[#allocation10 + $0x28] sm:$0xff]  }
 0x2bd   :  { %2601 = vmatprep.subr.bf16.mxu0 %v4002_v17  ;;  %2687 = vmatprep.subr.bf16.mxu1 %v4005_v18  ;;  %v4077_v16 = vld [vmem:[#allocation10 + $0xa8] sm:$0xff]   ;;  %v4078_v17 = vld [vmem:[#allocation10 + $0x70] sm:$0xff]  }
 0x2be   :  { %v4079_v18 = vld [vmem:[#allocation10 + $0xf0] sm:$0xff]  }
 0x2c0   :  { %2602 = vmatpush1.bf16.msra.mxu0 %v4000_v60  ;;  %2688 = vmatpush1.bf16.msra.mxu1 %v4003_v19  ;;  %v4080_v60 = vld [vmem:[#allocation10 + $0x30] sm:$0xff]  }
 0x2c1   :  { %2603 = vmatprep.subr.bf16.mxu0 %v4008_v22  ;;  %2689 = vmatprep.subr.bf16.mxu1 %v4011_v25  ;;  %v4081_v19 = vld [vmem:[#allocation10 + $0xb0] sm:$0xff]   ;;  %v4082_v22 = vld [vmem:[#allocation10 + $0x78] sm:$0xff]  }
 0x2c2   :  { %v4083_v25 = vld [vmem:[#allocation10 + $0xf8] sm:$0xff]  }
 0x2c4   :  { %2604 = vmatpush1.bf16.msra.mxu0 %v4006_v26  ;;  %2690 = vmatpush1.bf16.msra.mxu1 %v4009_v27  ;;  %v4084_v26 = vld [vmem:[#allocation10 + $0x38] sm:$0xff]  }
 0x2c5   :  { %2605 = vmatprep.subr.bf16.mxu0 %v4014_v28  ;;  %2691 = vmatprep.subr.bf16.mxu1 %v4017_v29  ;;  %v4085_v27 = vld [vmem:[#allocation10 + $0xb8] sm:$0xff]   ;;  %v1882_v28 = vld [vmem:[%s4460_s8] sm:$0xf] }
 0x2c6   :  { %v1887_v29 = vrot.slane %v1882_v28, %v4394_v20 }
 0x2c8   :  { %2606 = vmatpush1.bf16.msra.mxu0 %v4012_v30  ;;  %2692 = vmatpush1.bf16.msra.mxu1 %v4015_v31  ;;  %v1895_v30 = vrot.slane %v1882_v28, %v4396_v21  ;;  %v1891_v31 = vrot.slane %v1882_v28, %v4401_v23 }
 0x2c9   :  { %2607 = vmatprep.subr.bf16.mxu0 %v4020_v32  ;;  %2693 = vmatprep.subr.bf16.mxu1 %v4023_v33  ;;  %v1899_v32 = vrot.slane %v1882_v28, %v4403_v24 }
 0x2cc   :  { %2608 = vmatpush1.bf16.msra.mxu0 %v4018_v34  ;;  %2694 = vmatpush1.bf16.msra.mxu1 %v4021_v35 }
 0x2cd   :  { %2609 = vmatprep.subr.bf16.mxu0 %v4026_v36  ;;  %2695 = vmatprep.subr.bf16.mxu1 %v4029_v37 }
 0x2d0   :  { %2610 = vmatpush1.bf16.msra.mxu0 %v4024_v38  ;;  %2696 = vmatpush1.bf16.msra.mxu1 %v4027_v39 }
 0x2d1   :  { %2611 = vmatprep.subr.bf16.mxu0 %v4032_v40  ;;  %2697 = vmatprep.subr.bf16.mxu1 %v4035_v41 }
 0x2d4   :  { %2612 = vmatpush1.bf16.msra.mxu0 %v4030_v42  ;;  %2698 = vmatpush1.bf16.msra.mxu1 %v4033_v43 }
 0x2d5   :  { %2613 = vmatprep.subr.bf16.mxu0 %v4038_v44  ;;  %2699 = vmatprep.subr.bf16.mxu1 %v4041_v45 }
 0x2d8   :  { %2614 = vmatpush1.bf16.msra.mxu0 %v4036_v46  ;;  %2700 = vmatpush1.bf16.msra.mxu1 %v4039_v47 }
 0x2d9   :  { %2615 = vmatprep.subr.bf16.mxu0 %v4044_v48  ;;  %2701 = vmatprep.subr.bf16.mxu1 %v4047_v50 }
 0x2dc   :  { %2616 = vmatpush1.bf16.msra.mxu0 %v4042_v51  ;;  %2702 = vmatpush1.bf16.msra.mxu1 %v4045_v52 }
 0x2dd   :  { %2617 = vmatprep.subr.bf16.mxu0 %v4050_v53  ;;  %2703 = vmatprep.subr.bf16.mxu1 %v4053_v54 }
 0x2e0   :  { %2618 = vmatpush1.bf16.msra.mxu0 %v4048_v55  ;;  %2704 = vmatpush1.bf16.msra.mxu1 %v4051_v56 }
 0x2e1   :  { %3472 = vmatprep.subr.bf16.mxu0 %v4054_v57  ;;  %3494 = vmatprep.subr.bf16.mxu1 %v4055_v58 }
 0x2e3   :  { %2620 = vmatmul.mubr.bf16.vlgmr.msra.gmra.mrb[8].mxu0 %v4424_v49  ;;  %2706 = vmatmul.mubr.bf16.vlgmr.msra.gmra.mrb[8].mxu1 %v4424_v49  ;;  %v4069_v49 = vld [vmem:[#allocation10 + $0x98] sm:$0xff]  }
 0x2e4   :  { %3473 = vmatpush3.bf16.msra.mxu0 %v4056_v59  ;;  %3495 = vmatpush3.bf16.msra.mxu1 %v4057_v61 }
 0x2e5   :  { %3474 = vmatprep.subr.bf16.mxu0 %v4058_v62  ;;  %3496 = vmatprep.subr.bf16.mxu1 %v4059_v63 }
 0x2e8   :  { %3475 = vmatpush3.bf16.msra.mxu0 %v4060_v0  ;;  %3497 = vmatpush3.bf16.msra.mxu1 %v4061_v1 }
 0x2e9   :  { %3476 = vmatprep.subr.bf16.mxu0 %v4062_v2  ;;  %3498 = vmatprep.subr.bf16.mxu1 %v4063_v3 }
 0x2ec   :  { %3477 = vmatpush3.bf16.msra.mxu0 %v4064_v4  ;;  %3499 = vmatpush3.bf16.msra.mxu1 %v4065_v5  ;;  %v3439_v5 = vld [vmem:[%s4462_s10] ss:$0 sm:$0xff]  ;;  %s4196_s10 = scalar_lea.vmem %s3097_s12, 256 }
 0x2ed   :  { %3478 = vmatprep.subr.bf16.mxu0 %v4066_v6  ;;  %3500 = vmatprep.subr.bf16.mxu1 %v4067_v7  ;;  %p4197_p12 = scmp.ne.s32.totalorder %s3097_s12, %s4196_s10  ;;  %p4202_p0 = scmp.lt.s32.totalorder %s4196_s10, %s4196_s10 }
 0x2ef   :  { %p4203_p1 = por %p4202_p0, %p4201_p13 }
 0x2f0   :  { %3479 = vmatpush3.bf16.msra.mxu0 %v4068_v8  ;;  %3501 = vmatpush3.bf16.msra.mxu1 %v4069_v49 }
 0x2f1   :  { %3480 = vmatprep.subr.bf16.mxu0 %v4070_v9  ;;  %3502 = vmatprep.subr.bf16.mxu1 %v4071_v10  ;;  %p4204_p2 = pnand %p4203_p1, %p4197_p12 }
 0x2f4   :  { %3481 = vmatpush3.bf16.msra.mxu0 %v4072_v11  ;;  %3503 = vmatpush3.bf16.msra.mxu1 %v4073_v12 }
 0x2f5   :  { %3482 = vmatprep.subr.bf16.mxu0 %v4074_v13  ;;  %3504 = vmatprep.subr.bf16.mxu1 %v4075_v14 }
 0x2f8   :  { %3483 = vmatpush3.bf16.msra.mxu0 %v4076_v15  ;;  %3505 = vmatpush3.bf16.msra.mxu1 %v4077_v16 }
 0x2f9   :  { %3484 = vmatprep.subr.bf16.mxu0 %v4078_v17  ;;  %3506 = vmatprep.subr.bf16.mxu1 %v4079_v18 }
 0x2fc   :  { %3485 = vmatpush3.bf16.msra.mxu0 %v4080_v60  ;;  %3507 = vmatpush3.bf16.msra.mxu1 %v4081_v19 }
 0x2fd   :  { %3486 = vmatprep.subr.bf16.mxu0 %v4082_v22  ;;  %3508 = vmatprep.subr.bf16.mxu1 %v4083_v25 }
 0x300   :  { %3487 = vmatpush3.bf16.msra.mxu0 %v4084_v26  ;;  %3509 = vmatpush3.bf16.msra.mxu1 %v4085_v27 }
 0x3b6   :  { %v2621_v33 = vpop.f32.mrb[8].mxu0  ;;  %v2707_v34 = vpop.f32.mrb[8].mxu1 }
 0x3b7   :  { %v3524_v35 = vadd.f32 %v2621_v33, %v1887_v29  ;;  %v3528_v36 = vadd.f32 %v2707_v34, %v1895_v30  ;;  %v2623_v37 = vpop.f32.mrb[9].mxu0  ;;  %v2709_v38 = vpop.f32.mrb[9].mxu1 }
 0x3b8   :  { %v3525_v39 = vadd.f32 %v2623_v37, %v1891_v31  ;;  %v3529_v40 = vadd.f32 %v2709_v38, %v1899_v32  ;;  %v2625_v41 = vpop.f32.mrb[10].mxu0  ;;  %v2711_v42 = vpop.f32.mrb[10].mxu1 }
 0x3b9   :  { %vm2716_vm2 = vcmp.gt.f32.partialorder %v3524_v35, 0.0  ;;  %v2724_v43 = vmul.f32 0.2, %v3524_v35  ;;  %vm2718_vm3 = vcmp.gt.f32.partialorder %v3528_v36, 0.0  ;;  %v2726_v20 = vmul.f32 0.2, %v3528_v36 }
 0x3ba   :  { %vm2717_vm4 = vcmp.gt.f32.partialorder %v3525_v39, 0.0  ;;  %v2725_v21 = vmul.f32 0.2, %v3525_v39  ;;  %vm2719_vm5 = vcmp.gt.f32.partialorder %v3529_v40, 0.0  ;;  %v2727_v23 = vmul.f32 0.2, %v3529_v40 }
 0x3bb   :  { %v3526_v44 = vadd.f32 %v2625_v41, %v1887_v29  ;;  %v3530_v24 = vadd.f32 %v2711_v42, %v1895_v30  ;;  %v2627_v45 = vpop.f32.mrb[11].mxu0  ;;  %v2713_v46 = vpop.f32.mrb[11].mxu1  ;;  %v2732_v47 = vsel %vm2716_vm2, %v3524_v35, %v2724_v43  ;;  %v2734_v48 = vsel %vm2718_vm3, %v3528_v36, %v2726_v20 }
 0x3bc   :  { %v3527_v50 = vadd.f32 %v2627_v45, %v1891_v31  ;;  %v3531_v51 = vadd.f32 %v2713_v46, %v1899_v32  ;;  %v2733_v58 = vsel %vm2717_vm4, %v3525_v39, %v2725_v21  ;;  %v2735_v59 = vsel %vm2719_vm5, %v3529_v40, %v2727_v23 }
 0x3bd   :  { %vm2720_vm6 = vcmp.gt.f32.partialorder %v3526_v44, 0.0  ;;  %v2728_v52 = vmul.f32 0.2, %v3526_v44  ;;  %vm2722_vm7 = vcmp.gt.f32.partialorder %v3530_v24, 0.0  ;;  %v2730_v53 = vmul.f32 0.2, %v3530_v24 }
 0x3be   :  { %vm2721_vm8 = vcmp.gt.f32.partialorder %v3527_v50, 0.0  ;;  %v2729_v54 = vmul.f32 0.2, %v3527_v50  ;;  %vm2723_vm9 = vcmp.gt.f32.partialorder %v3531_v51, 0.0  ;;  %v2731_v55 = vmul.f32 0.2, %v3531_v51 }
 0x3bf   :  { %v2736_v56 = vsel %vm2720_vm6, %v3526_v44, %v2728_v52  ;;  %v2738_v57 = vsel %vm2722_vm7, %v3530_v24, %v2730_v53 }
 0x3c0   :  { %v2740_v61 = vpack.c.bf16 %v2736_v56, %v2732_v47  ;;  %v2742_v62 = vpack.c.bf16 %v2738_v57, %v2734_v48  ;;  %v2737_v63 = vsel %vm2721_vm8, %v3527_v50, %v2729_v54  ;;  %v2739_v0 = vsel %vm2723_vm9, %v3531_v51, %v2731_v55 }
 0x3c1   :  { %v2741_v1 = vpack.c.bf16 %v2737_v63, %v2733_v58  ;;  %v2743_v2 = vpack.c.bf16 %v2739_v0, %v2735_v59 }
 0x3c3   :  { %3039 = vmatprep.mubr.bf16.mxu0 %v2741_v1  ;;  %3080 = vmatprep.mubr.bf16.mxu1 %v2743_v2 }
 0x3c4   :  { %3040 = vmatmul.mubr.bf16.vlgmr.msra.gmra.mrb[12].mxu0 %v2740_v61  ;;  %3081 = vmatmul.mubr.bf16.vlgmr.msra.gmra.mrb[12].mxu1 %v2742_v62 }
 0x497   :  { %v3488_v3 = vpop.f32.mrb[12].mxu0  ;;  %v3510_v4 = vpop.f32.mrb[12].mxu1 }
 0x498   :  { %v3489_v6 = vpop.f32.mrb[13].mxu0  ;;  %v3511_v7 = vpop.f32.mrb[13].mxu1 }
 0x499   :  { %v3490_v8 = vadd.f32 %v3489_v6, %v3488_v3  ;;  %v3512_v49 = vadd.f32 %v3511_v7, %v3510_v4  ;;  %v3491_v9 = vpop.f32.mrb[14].mxu0  ;;  %v3513_v10 = vpop.f32.mrb[14].mxu1 }
 0x49a   :  { %v3492_v11 = vpop.f32.mrb[15].mxu0  ;;  %v3514_v12 = vpop.f32.mrb[15].mxu1 }
 0x49b   :  { %v3042_v13 = vadd.f32 %v3490_v8, %v3439_v5  ;;  %v3493_v14 = vadd.f32 %v3492_v11, %v3491_v9  ;;  %v3515_v15 = vadd.f32 %v3514_v12, %v3513_v10 }
 0x49d   :  { %v3083_v16 = vadd.f32 %v3512_v49, %v3042_v13  ;;  %v3045_v17 = vadd.f32 %v3493_v14, %v3439_v5 }
 0x49f   :  { %3089 = vst [vmem:[#allocation11] sm:$0xff] %v3083_v16  ;;  %v3086_v18 = vadd.f32 %v3515_v15, %v3045_v17 }
 0x4a1   :  { %3090 = vst [vmem:[#allocation11 + $0x8] sm:$0xff] %v3086_v18 }
 0x4a2   :  { %4207 = shalt.err (!%p4204_p2)
}
 0x4a3   :  { %s4208_s15 = scalar_lea.hbm %s4463_s11, 256 }
 0x4a4   :  { %p4209_p3 = scmp.ne.s32.totalorder %s4463_s11, %s4208_s15  ;;  %p4212_p4 = scmp.lt.u32.totalorder %s4208_s15, %s4463_s11 }
 0x4a6   :  { %p4214_p5 = pnand %p4212_p4, %p4209_p3 }
 0x4a8   :  { %4217 = shalt.err (!%p4214_p5)
}
 0x4a9   :  { %s4237_s19 = smov 128   ;;  %s4238_s21 = smov 8  }
 0x4aa   :  { %3102 = dma.vmem_to_hbm [thread:$0]  %s3097_s12, 256, %s4463_s11, [#allocation4], %s4237_s19, %s4237_s19, %s4238_s21  }
 0x4ab   :  { %4224 = dma.done.wait [#allocation4], 256  }
 0x4ac   :  { %4225 = vsyncadd [#allocation4], 4294967040 }
 0x4ad   :  { %3106 = vsyncpa [#allocation3], 1 }
 0x4ae   :  { %3107 = vsyncpa [#allocation6], 1 }
 0x4af   :  { %3108 = vsyncpa [#allocation9], 1 }
 0x4b0   :  { %3109 = vsyncpa [#allocation4], 1 }

</bundles_post_ra>
